<compile_context>
chip_gen: v7x
topology: tpu7x:2x2x1
jax: 0.10.0
libtpu: 0.0.40
codegen_flags: <defaults>
</compile_context>

<pallas_src>
import math

import jax
import jax.numpy as jnp
from jax.experimental import pallas as pl
from jax.experimental.pallas import tpu as pltpu


def _compute_vmem_limit():
    """Scoped-VMEM request: ~3/4 of physical, capped at 96 MiB.
    v5e/v6e have 128 MiB -> 96 MiB; v7x has 64 MiB -> 48 MiB (leaves headroom
    for compiler-internal scratch / double buffers)."""
    cap = 128 * 1024 * 1024
    try:
        info = pltpu.get_tpu_info()
        cap = int(getattr(info, "vmem_capacity_bytes", cap))
    except Exception:
        pass
    return max(32 * 1024 * 1024, min(96 * 1024 * 1024, (cap * 3) // 4))


_VMEM_LIMIT = _compute_vmem_limit()


# ----------------------------------------------------------------------------
# Tiling helpers
# ----------------------------------------------------------------------------
def _round_up(v, m):
    return ((v + m - 1) // m) * m


def _largest_tile(total, unit, cap):
    """Largest multiple of `unit` dividing `total` and <= cap (fallback `unit`)."""
    best = unit
    d = unit
    lim = min(total, cap)
    while d <= lim:
        if total % d == 0:
            best = d
        d += unit
    return best


def _choose_row_tile(rows, step, target):
    """Largest divisor of `rows` that is a multiple of `step` and <= target,
    else rows (full extent)."""
    # TODO(synk): replace the TR=rows fallback with a cdiv grid + masked last
    # tile so awkward row counts never force an oversized VMEM tile.
    best = None
    d = step
    lim = min(rows, target)
    while d <= lim:
        if rows % d == 0:
            best = d
        d += step
    return best if best is not None else rows


# ----------------------------------------------------------------------------
# Pallas kernels
# ----------------------------------------------------------------------------
def _make_matmul_kernel_1k(with_stats):
    """num_k == 1 fast path: y = x @ w + b written directly, no scratch."""
    def kernel(x_ref, w_ref, b_ref, *rest):
        if with_stats:
            y_ref, s_ref = rest
        else:
            (y_ref,) = rest
        # bf16 operands, f32 accumulation on the MXU.
        y = jnp.dot(x_ref[...], w_ref[...],
                    preferred_element_type=jnp.float32) + b_ref[...]
        y_ref[...] = y.astype(y_ref.dtype)
        if with_stats:
            # single 2-row store (avoids two masked 1-sublane stores)
            s_ref[...] = jnp.concatenate(
                [jnp.sum(y, axis=0, keepdims=True),
                 jnp.sum(y * y, axis=0, keepdims=True)], axis=0)
    return kernel


def _make_matmul_kernel_acc(with_stats):
    """num_k > 1 (only for very large Cin): tiled contraction, f32 scratch."""
    def kernel(x_ref, w_ref, b_ref, *rest):
        if with_stats:
            y_ref, s_ref, acc_ref = rest
        else:
            y_ref, acc_ref = rest
        ki = pl.program_id(2)

        @pl.when(ki == 0)
        def _():
            acc_ref[...] = jnp.zeros_like(acc_ref)

        acc_ref[...] += jnp.dot(x_ref[...], w_ref[...],
                                preferred_element_type=jnp.float32)

        @pl.when(ki == pl.num_programs(2) - 1)
        def _():
            y = acc_ref[...] + b_ref[...]
            y_ref[...] = y.astype(y_ref.dtype)
            if with_stats:
                s_ref[...] = jnp.concatenate(
                    [jnp.sum(y, axis=0, keepdims=True),
                     jnp.sum(y * y, axis=0, keepdims=True)], axis=0)
    return kernel


def _make_norm_act_max_kernel(use_act, reduce_max, k, rows_out, cout_p):
    """Per-row-tile: y*scale+shift (GroupNorm), LeakyReLU(0.2), max over k."""
    def kernel(y_ref, sc_ref, sh_ref, o_ref):
        y = y_ref[...].astype(jnp.float32) * sc_ref[...] + sh_ref[...]
        if use_act:
            y = jnp.where(y >= 0, y, 0.2 * y)
        if reduce_max:
            y = jnp.max(y.reshape(rows_out, k, cout_p), axis=1)
        o_ref[...] = y.astype(o_ref.dtype)
    return kernel


# ----------------------------------------------------------------------------
# Fused 1x1 conv + GroupNorm(32) + LeakyReLU(0.2) + optional max-over-k
# ----------------------------------------------------------------------------
def conv1x1_fused(x, w, b=None, gamma=None, beta=None, *, use_norm=True,
                  use_act=True, reduce_max=False, K=1, num_groups=32,
                  row_tile=2048, cin_tile_cap=4096, out_padded_bf16=False):
    """x: (B, R, Cin) f32, or (B, R, Cin_p) lane-padded bf16; w: (Cin, Cout).
    Returns (B, R//K, Cout) f32, or (B, R//K, Cout_p) bf16 if out_padded_bf16."""
    B, R, xc = x.shape
    Cin, Cout = w.shape
    if not reduce_max:
        K = 1
    N_out = R // K
    has_pass2 = use_norm or use_act or reduce_max

    Cin_p = _round_up(Cin, 128)
    Cout_p = _round_up(Cout, 128)

    # Accept activations already lane-padded bf16 (from a previous fused block
    # or from get_graph_feature): skips the per-layer XLA pad/cast pass.
    if x.dtype == jnp.bfloat16 and xc == Cin_p:
        xb = x
    else:
        assert xc == Cin, (xc, Cin)
        xb = jnp.pad(x, ((0, 0), (0, 0), (0, Cin_p - Cin))).astype(jnp.bfloat16)
    wb = jnp.pad(w, ((0, Cin_p - Cin), (0, Cout_p - Cout))).astype(jnp.bfloat16)
    if b is None:
        bp = jnp.zeros((1, Cout_p), jnp.float32)
    else:
        bp = jnp.pad(b.astype(jnp.float32), (0, Cout_p - Cout)).reshape(1, Cout_p)

    if Cin_p <= cin_tile_cap:
        TCin, num_k = Cin_p, 1                 # single contraction step
    else:
        TCin = _largest_tile(Cin_p, 128, cin_tile_cap)
        num_k = Cin_p // TCin
    # TR multiple of 16*K keeps bf16 (16,128) tiling valid on both passes and
    # keeps the (rows, K, C) max-over-k reshape layout-free.
    TR = _choose_row_tile(R, 16 * K, row_tile)
    num_rt = R // TR

    y_dtype = jnp.bfloat16 if has_pass2 else jnp.float32
    y_shape = jax.ShapeDtypeStruct((B, R, Cout_p), y_dtype)

    def _params(sem):
        return pltpu.CompilerParams(dimension_semantics=sem,
                                    vmem_limit_bytes=_VMEM_LIMIT)

    # ---- pass 1: matmul (+bias), fused per-tile channel sums -----------------
    if num_k == 1:
        in_specs = [
            pl.BlockSpec((pl.Squeezed(), TR, Cin_p), lambda bi, ri: (bi, ri, 0)),
            pl.BlockSpec((Cin_p, Cout_p), lambda bi, ri: (0, 0)),   # resident W
            pl.BlockSpec((1, Cout_p), lambda bi, ri: (0, 0)),
        ]
        y_spec = pl.BlockSpec((pl.Squeezed(), TR, Cout_p),
                              lambda bi, ri: (bi, ri, 0))
        if use_norm:
            s_shape = jax.ShapeDtypeStruct((B, num_rt, 2, Cout_p), jnp.float32)
            s_spec = pl.BlockSpec((pl.Squeezed(), pl.Squeezed(), 2, Cout_p),
                                  lambda bi, ri: (bi, ri, 0, 0))
            y, stats = pl.pallas_call(
                _make_matmul_kernel_1k(True),
                out_shape=(y_shape, s_shape),
                grid=(B, num_rt),
                in_specs=in_specs,
                out_specs=(y_spec, s_spec),
                compiler_params=_params(("parallel", "parallel")),
            )(xb, wb, bp)
        else:
            y = pl.pallas_call(
                _make_matmul_kernel_1k(False),
                out_shape=y_shape,
                grid=(B, num_rt),
                in_specs=in_specs,
                out_specs=y_spec,
                compiler_params=_params(("parallel", "parallel")),
            )(xb, wb, bp)
    else:
        in_specs = [
            pl.BlockSpec((pl.Squeezed(), TR, TCin), lambda bi, ri, ki: (bi, ri, ki)),
            pl.BlockSpec((TCin, Cout_p), lambda bi, ri, ki: (ki, 0)),
            pl.BlockSpec((1, Cout_p), lambda bi, ri, ki: (0, 0)),
        ]
        y_spec = pl.BlockSpec((pl.Squeezed(), TR, Cout_p),
                              lambda bi, ri, ki: (bi, ri, 0))
        scratch = [pltpu.VMEM((TR, Cout_p), jnp.float32)]
        if use_norm:
            s_shape = jax.ShapeDtypeStruct((B, num_rt, 2, Cout_p), jnp.float32)
            s_spec = pl.BlockSpec((pl.Squeezed(), pl.Squeezed(), 2, Cout_p),
                                  lambda bi, ri, ki: (bi, ri, 0, 0))
            y, stats = pl.pallas_call(
                _make_matmul_kernel_acc(True),
                out_shape=(y_shape, s_shape),
                grid=(B, num_rt, num_k),
                in_specs=in_specs,
                out_specs=(y_spec, s_spec),
                scratch_shapes=scratch,
                compiler_params=_params(("parallel", "parallel", "arbitrary")),
            )(xb, wb, bp)
        else:
            y = pl.pallas_call(
                _make_matmul_kernel_acc(False),
                out_shape=y_shape,
                grid=(B, num_rt, num_k),
                in_specs=in_specs,
                out_specs=y_spec,
                scratch_shapes=scratch,
                compiler_params=_params(("parallel", "parallel", "arbitrary")),
            )(xb, wb, bp)

    if not has_pass2:
        return y[:, :, :Cout] if Cout != Cout_p else y      # f32, e.g. conv6

    # ---- GroupNorm(32) scale/shift per batch, from the fused channel sums ----
    if use_norm:
        if gamma is None:
            gamma = jnp.ones((Cout,), jnp.float32)
        if beta is None:
            beta = jnp.zeros((Cout,), jnp.float32)
        cg = Cout // num_groups
        cnt = float(R * cg)
        s = jnp.sum(stats, axis=1)                           # (B, 2, Cout_p)
        s1 = s[:, 0, :Cout]
        s2 = s[:, 1, :Cout]
        gs1 = jnp.sum(s1.reshape(B, num_groups, cg), axis=-1)
        gs2 = jnp.sum(s2.reshape(B, num_groups, cg), axis=-1)
        mean = gs1 / cnt
        # E[x^2] - mean^2 in f32, clamped >= 0 to guard against cancellation.
        var = jnp.maximum(gs2 / cnt - mean * mean, 0.0)
        inv = jax.lax.rsqrt(var + 1e-5)
        mean_c = jnp.repeat(mean, cg, axis=1)                # (B, Cout)
        inv_c = jnp.repeat(inv, cg, axis=1)
        scale = gamma[None, :] * inv_c
        shift = beta[None, :] - mean_c * scale
    else:
        scale = jnp.ones((B, Cout), jnp.float32)
        shift = jnp.zeros((B, Cout), jnp.float32)
    scale_p = jnp.pad(scale, ((0, 0), (0, Cout_p - Cout)))[:, None, :]
    shift_p = jnp.pad(shift, ((0, 0), (0, Cout_p - Cout)))[:, None, :]

    # ---- pass 2: normalize + LeakyReLU + max over the K neighbor axis --------
    rows_out = TR // K
    o_dtype = jnp.bfloat16 if out_padded_bf16 else jnp.float32
    out = pl.pallas_call(
        _make_norm_act_max_kernel(use_act, reduce_max, K, rows_out, Cout_p),
        out_shape=jax.ShapeDtypeStruct((B, N_out, Cout_p), o_dtype),
        grid=(B, num_rt),
        in_specs=[
            pl.BlockSpec((pl.Squeezed(), TR, Cout_p), lambda bi, ri: (bi, ri, 0)),
            pl.BlockSpec((pl.Squeezed(), 1, Cout_p), lambda bi, ri: (bi, 0, 0)),
            pl.BlockSpec((pl.Squeezed(), 1, Cout_p), lambda bi, ri: (bi, 0, 0)),
        ],
        out_specs=pl.BlockSpec((pl.Squeezed(), rows_out, Cout_p),
                               lambda bi, ri: (bi, ri, 0)),
        compiler_params=_params(("parallel", "parallel")),
    )(y, scale_p, shift_p)
    if out_padded_bf16:
        return out                                            # (B, N_out, Cout_p) bf16
    return out[:, :, :Cout] if Cout != Cout_p else out        # f32


# ----------------------------------------------------------------------------
# Graph helpers (plain-JAX glue, semantics mirror the torch reference).
# ----------------------------------------------------------------------------
def knn_idx(pos, k):
    # pos: (B, 3, N).  torch: cdist(x1,x1).topk(k, largest=False)[1]
    x1 = jnp.transpose(pos, (0, 2, 1))                       # (B, N, 3)
    sq = jnp.sum(x1 * x1, axis=-1)
    d2 = sq[:, :, None] - 2.0 * jnp.einsum('bnc,bmc->bnm', x1, x1) + sq[:, None, :]
    _, idx = jax.lax.top_k(-d2, k)                           # k nearest
    return idx


def get_graph_feature(x, pos, k, pad_to=None):
    """x:(B,C,N), pos:(B,3,N) -> bf16 channels-last edge features
    (B, N*k, pad_to or 2C+4), zero-padded on the channel axis so the fused
    conv consumes it with no extra pad/cast pass."""
    # TODO(synk): fuse this k-neighbor gather + concat into conv pass 1 via a
    # scalar-prefetched idx / DMA gather so the k-times-larger edge-feature
    # tensor is never materialized in HBM.
    B, C, N = x.shape
    idx = knn_idx(pos, k)                                    # (B, N, k)
    xt = jnp.transpose(x, (0, 2, 1)).astype(jnp.bfloat16)    # (B, N, C) bf16
    post = jnp.transpose(pos, (0, 2, 1))                     # (B, N, 3) f32
    bidx = jnp.arange(B)[:, None, None]
    feature = xt[bidx, idx]                                  # (B, N, k, C) bf16
    feature_pos = post[bidx, idx]                            # (B, N, k, 3) f32
    xc = jnp.broadcast_to(xt[:, :, None, :], (B, N, k, C))
    pc = jnp.broadcast_to(post[:, :, None, :], (B, N, k, 3))
    # nn.PairwiseDistance(p=2, eps=1e-6) on (B,3,k,N) views, reduced over dim=1,
    # then raw-reshaped to (B, N, k, 1) exactly as the torch code does.
    x_pos2 = jnp.transpose(pc, (0, 3, 2, 1))                 # (B, 3, k, N)
    f_pos2 = jnp.transpose(feature_pos, (0, 3, 2, 1))
    dist = jnp.sqrt(jnp.sum((x_pos2 - f_pos2 + 1e-6) ** 2, axis=1, keepdims=True))
    feature_add = dist.reshape(B, N, k, 1)
    parts = [feature - xc,
             (feature_pos - pc).astype(jnp.bfloat16),
             feature_add.astype(jnp.bfloat16),
             xc]
    cin = 2 * C + 4
    if pad_to is not None and pad_to > cin:
        parts.append(jnp.zeros((B, N, k, pad_to - cin), jnp.bfloat16))
        cin = pad_to
    feat = jnp.concatenate(parts, axis=3)
    return feat.reshape(B, N * k, cin)


def fps_indices(rows, B, n_per_batch, ratio):
    """torch_cluster.fps semantics per batch segment — fully on-device."""
    # TODO(synk): torch_cluster.fps uses a random start point; we deterministically start at 0.
    ns = int(math.ceil(ratio * n_per_batch))
    pts = rows.reshape(B, n_per_batch, -1).astype(jnp.float32)

    def one(seg):
        d0 = jnp.sum((seg - seg[0]) ** 2, axis=-1)
        sel0 = jnp.zeros((ns,), jnp.int32)

        def body(i, carry):
            sel, d = carry
            j = jnp.argmax(d).astype(jnp.int32)
            sel = sel.at[i].set(j)
            d = jnp.minimum(d, jnp.sum((seg - seg[j]) ** 2, axis=-1))
            return (sel, d)

        sel, _ = jax.lax.fori_loop(1, ns, body, (sel0, d0))
        return sel

    sel = jax.vmap(one)(pts)                                 # (B, ns)
    base = (jnp.arange(B, dtype=jnp.int32) * n_per_batch)[:, None]
    return (sel + base).reshape(-1)


def knn_interpolate(xf, pos_x, pos_y, batch_x, batch_y, k=3):
    """torch_geometric.nn.knn_interpolate (k=3, inverse-squared-distance)."""
    d2 = jnp.sum((pos_y[:, None, :] - pos_x[None, :, :]) ** 2, axis=-1)
    d2 = jnp.where(batch_y[:, None] != batch_x[None, :], jnp.inf, d2)
    neg_d2, nn_i = jax.lax.top_k(-d2, k)
    nd2 = -neg_d2
    w = 1.0 / jnp.maximum(nd2, 1e-16)
    feats = xf[nn_i]                                         # (Ny, k, F)
    return jnp.sum(feats * w[..., None], axis=1) / jnp.sum(w, axis=1, keepdims=True)


# ----------------------------------------------------------------------------
# Modules
# ----------------------------------------------------------------------------
def transform_net(feat0, P, K):
    """Transform_Net(k=3).  feat0: (B, N*K, 128) lane-padded bf16 (10 valid ch)."""
    B = feat0.shape[0]
    h = conv1x1_fused(feat0, P['t_conv1']['w'], None, P['t_conv1']['gamma'],
                      P['t_conv1']['beta'], out_padded_bf16=True)
    h = conv1x1_fused(h, P['t_conv1_2']['w'], None, P['t_conv1_2']['gamma'],
                      P['t_conv1_2']['beta'], out_padded_bf16=True)
    h = conv1x1_fused(h, P['t_conv2']['w'], None, P['t_conv2']['gamma'],
                      P['t_conv2']['beta'], reduce_max=True, K=K,
                      out_padded_bf16=True)                  # (B, N, 128): AdaptiveMaxPool2d((N,1))
    h = conv1x1_fused(h, P['t_conv3']['w'], None, P['t_conv3']['gamma'],
                      P['t_conv3']['beta'], out_padded_bf16=True)   # (B, N, 1024)
    h = jnp.max(h, axis=1).astype(jnp.float32)               # AdaptiveMaxPool1d(1) -> (B, 1024)
    # TODO(synk): BatchNorm1d bn4/bn5 evaluated with running stats (eval mode).
    h = h @ P['t_l1']
    h = h * (1.0 / math.sqrt(1.0 + 1e-5))
    h = jnp.where(h >= 0, h, 0.2 * h)
    h = h @ P['t_l2']
    h = h * (1.0 / math.sqrt(1.0 + 1e-5))
    h = jnp.where(h >= 0, h, 0.2 * h)
    t = h @ P['t_tw'] + P['t_tb']                            # weight=0, bias=eye
    return t.reshape(B, 3, 3) + jnp.eye(3, dtype=jnp.float32)[None]


def edge_conv(x, pos, k, p):
    """GraphConv(layer=1, pyramid=False, dilation_rate=1): one fused conv + max-k."""
    cin_p = _round_up(2 * x.shape[1] + 4, 128)
    feat = get_graph_feature(x, pos, k, pad_to=cin_p)        # (B, N*k, cin_p) bf16
    out = conv1x1_fused(feat, p['w'], p['b'], p['gamma'], p['beta'],
                        use_norm=True, use_act=True, reduce_max=True, K=k)
    return jnp.transpose(out, (0, 2, 1))                     # (B, Cout, N) f32


def gagcn_forward(x_in, P, k=8):
    B, _, N = x_in.shape
    # Spatial transform
    feat0 = get_graph_feature(x_in, x_in, k, pad_to=128)     # 10 valid channels
    t = transform_net(feat0, P, K=k)
    x = jnp.einsum('bnc,bcd->bnd', jnp.transpose(x_in, (0, 2, 1)), t)
    x = jnp.transpose(x, (0, 2, 1))                          # (B, 3, N)
    pos = x
    pos_1 = pos

    x1 = edge_conv(x, pos_1, k, P['edge1'])                  # (B, 128, N)
    x1_upsample = x1
    bs = jnp.repeat(jnp.arange(B), N)
    pos_upsample = pos.reshape(3, -1)                        # raw reshape as in torch
    pos_rows = jnp.transpose(pos, (2, 1, 0)).reshape(N * B, -1)
    x1_rows = jnp.transpose(x1, (2, 1, 0)).reshape(N * B, -1)

    n2 = int(math.ceil(0.375 * N))
    idx = fps_indices(pos_rows, B, N, 0.375)
    pos2 = jnp.transpose(pos_rows[idx].reshape(-1, 3, B), (2, 1, 0))    # (B, 3, n2)
    pos2_1 = pos2
    x2 = jnp.transpose(x1_rows[idx].reshape(-1, x1_rows.shape[1], B), (2, 1, 0))
    x2 = edge_conv(x2, pos2_1, k, P['edge2'])                # (B, 256, n2)
    x2_upsample = x2
    bs2 = jnp.repeat(jnp.arange(B), n2)
    pos2_upsample = pos2.reshape(3, -1)
    pos2_rows = jnp.transpose(pos2, (2, 1, 0)).reshape(n2 * B, -1)
    x2_rows = jnp.transpose(x2, (2, 1, 0)).reshape(n2 * B, -1)

    n3 = int(math.ceil((1.0 / 3.0) * n2))
    idx = fps_indices(pos2_rows, B, n2, 1.0 / 3.0)
    pos3 = jnp.transpose(pos2_rows[idx].reshape(-1, 3, B), (2, 1, 0))   # (B, 3, n3)
    pos3_1 = pos3
    pos3_upsample = pos3.reshape(3, -1)
    x3 = jnp.transpose(x2_rows[idx].reshape(-1, x2_rows.shape[1], B), (2, 1, 0))
    x3 = edge_conv(x3, pos3_1, k, P['edge3'])                # (B, 1024, n3)
    bs3 = jnp.repeat(jnp.arange(B), n3)

    pos3f, pos2f, posf = pos3_upsample, pos2_upsample, pos_upsample
    x3_2 = x3.reshape(B * n3, -1)                            # (B*n3, 1024)
    x4 = knn_interpolate(x3_2, pos3f.reshape(B * n3, 3), pos2f.reshape(B * n2, 3), bs3, bs2)
    x4 = x4.reshape(B, x3_2.shape[1], -1)                    # (B, 1024, n2)
    x4 = jnp.concatenate([x4, x2_upsample], axis=1)          # (B, 1280, n2)
    x4 = edge_conv(x4, pos2_1, k, P['edge4'])                # (B, 256, n2)

    x4_2 = x4.reshape(B * n2, -1)
    x5 = knn_interpolate(x4_2, pos2f.reshape(B * n2, 3), posf.reshape(B * N, 3), bs2, bs)
    x5 = x5.reshape(B, x4_2.shape[1], -1)                    # (B, 256, N)
    x5 = jnp.concatenate([x5, x1_upsample], axis=1)          # (B, 384, N)
    x5 = edge_conv(x5, pos_1, k, P['edge5'])                 # (B, 256, N)
    x5 = edge_conv(x5, pos_1, k, P['edge6'])                 # (B, 256, N)

    # Head: Conv1d + GN + LReLU twice (carried lane-padded bf16), dropout
    # (identity in eval), final Conv1d.
    h = jnp.transpose(x5, (0, 2, 1))                         # (B, N, 256)
    h = conv1x1_fused(h, P['conv4']['w'], P['conv4']['b'], P['conv4']['gamma'],
                      P['conv4']['beta'], out_padded_bf16=True)
    h = conv1x1_fused(h, P['conv5']['w'], P['conv5']['b'], P['conv5']['gamma'],
                      P['conv5']['beta'], out_padded_bf16=True)
    # TODO(synk): Dropout(p=0.5) treated as identity (eval mode).
    h = conv1x1_fused(h, P['conv6']['w'], P['conv6']['b'], use_norm=False, use_act=False)
    return jnp.transpose(h, (0, 2, 1))                       # (B, seg_num_all, N)


# ----------------------------------------------------------------------------
# Deterministic parameter init (shapes follow GAGCN.__init__, norm='group').
# ----------------------------------------------------------------------------
def init_params(key, seg_num_all):
    keys = iter(jax.random.split(key, 80))

    def lin(cin, cout, bias=True):
        kw, kb = next(keys), next(keys)
        bound = 1.0 / math.sqrt(cin)
        w = jax.random.uniform(kw, (cin, cout), jnp.float32, -bound, bound)
        b = (jax.random.uniform(kb, (cout,), jnp.float32, -bound, bound)
             if bias else jnp.zeros((cout,), jnp.float32))
        return w, b

    def conv_block(cin, cout, bias=True):
        w, b = lin(cin, cout, bias)
        return dict(w=w, b=b, gamma=jnp.ones((cout,), jnp.float32),
                    beta=jnp.zeros((cout,), jnp.float32))

    P = {}
    # Transform_Net(k=3): conv inputs = 3*3+1 = 10
    P['t_conv1'] = conv_block(10, 64, bias=False)
    P['t_conv1_2'] = conv_block(64, 64, bias=False)
    P['t_conv2'] = conv_block(64, 128, bias=False)
    P['t_conv3'] = conv_block(128, 1024, bias=False)
    P['t_l1'], _ = lin(1024, 512, bias=False)
    P['t_l2'], _ = lin(512, 256, bias=False)
    P['t_tw'] = jnp.zeros((256, 9), jnp.float32)             # init.constant_(weight, 0)
    P['t_tb'] = jnp.eye(3, dtype=jnp.float32).reshape(9)     # init.eye_(bias.view(3,3))
    # Edge convs (GraphConv layer=1): single Conv2d(in,out) + GN(32,out) + LReLU
    P['edge1'] = conv_block(9 + 1, 128)
    P['edge2'] = conv_block(64 * 2 * 2 + 3 + 1, 256)
    P['edge3'] = conv_block(64 * 2 * 2 * 2 + 3 + 1, 1024)
    P['edge4'] = conv_block(3 + 2 * (256 + 1024) + 1, 256)
    P['edge5'] = conv_block(3 + 2 * (128 + 256) + 1, 256)
    P['edge6'] = conv_block(3 + 2 * 256 + 1, 256)
    # Head
    P['conv4'] = conv_block(256, 256)
    P['conv5'] = conv_block(256, 256)
    w6, b6 = lin(256, seg_num_all)
    P['conv6'] = dict(w=w6, b=b6)
    return P


if __name__ == "__main__":
    B, N, K_NEIGH, SEG = 2, 64, 8, 16
    x = jax.random.normal(jax.random.PRNGKey(0), (B, 3, N), jnp.float32)
    params = init_params(jax.random.PRNGKey(1), SEG)
    out = gagcn_forward(x, params, k=K_NEIGH)
    out = jax.block_until_ready(out)
    assert out.shape == (B, SEG, N), out.shape
    assert bool(jnp.all(jnp.isfinite(out)))
    print("KERNEL_OK")
</pallas_src>

<mosaic_0001>
module attributes {stable_mosaic.version = 11 : i64} {
  func.func @kernel(%arg0: i32, %arg1: i32, %arg2: memref<1x512x128xbf16, #tpu.memory_space<vmem>>, %arg3: memref<128x128xbf16, #tpu.memory_space<vmem>>, %arg4: memref<1x128xf32, #tpu.memory_space<vmem>>, %arg5: memref<1x512x128xbf16, #tpu.memory_space<vmem>>, %arg6: memref<1x1x2x128xf32, #tpu.memory_space<vmem>>) attributes {dimension_semantics = [#tpu.dimension_semantics<parallel>, #tpu.dimension_semantics<parallel>], iteration_bounds = array<i64: 2, 1>, scalar_prefetch = 0 : i64, scratch_operands = 0 : i64, tpu.core_type = #tpu.core_type<tc>, window_params = [{transform_indices = @transform_0, window_bounds = array<i64: 1, 512, 128>}, {pipeline_mode = #tpu.pipeline_mode<synchronous>, transform_indices = @transform_1, window_bounds = array<i64: 128, 128>}, {pipeline_mode = #tpu.pipeline_mode<synchronous>, transform_indices = @transform_2, window_bounds = array<i64: 1, 128>}, {transform_indices = @transform_3, window_bounds = array<i64: 1, 512, 128>}, {transform_indices = @transform_4, window_bounds = array<i64: 1, 1, 2, 128>}]} {
    %c0 = arith.constant 0 : index
    %c0_0 = arith.constant 0 : index
    %c0_1 = arith.constant 0 : index
    %0 = vector.load %arg2[%c0, %c0_0, %c0_1] : memref<1x512x128xbf16, #tpu.memory_space<vmem>>, vector<1x512x128xbf16>
    %1 = vector.shape_cast %0 : vector<1x512x128xbf16> to vector<512x128xbf16>
    %c0_2 = arith.constant 0 : index
    %c0_3 = arith.constant 0 : index
    %2 = vector.load %arg3[%c0_2, %c0_3] : memref<128x128xbf16, #tpu.memory_space<vmem>>, vector<128x128xbf16>
    %cst = arith.constant dense<0.000000e+00> : vector<512x128xf32>
    %3 = tpu.matmul %1, %2, %cst {dimension_numbers = #tpu.dot_dimension_numbers<[1], [0], [0], [1], [0, 0, 1, 1], [], []>} : vector<512x128xbf16>, vector<128x128xbf16>, vector<512x128xf32> -> vector<512x128xf32>
    %c0_4 = arith.constant 0 : index
    %c0_5 = arith.constant 0 : index
    %4 = vector.load %arg4[%c0_4, %c0_5] : memref<1x128xf32, #tpu.memory_space<vmem>>, vector<1x128xf32>
    %5 = vector.broadcast %4 : vector<1x128xf32> to vector<512x128xf32>
    %6 = arith.addf %3, %5 : vector<512x128xf32>
    %7 = arith.truncf %6 : vector<512x128xf32> to vector<512x128xbf16>
    %c0_6 = arith.constant 0 : index
    %c0_7 = arith.constant 0 : index
    %c0_8 = arith.constant 0 : index
    %8 = vector.load %arg5[%c0_6, %c0_7, %c0_8] : memref<1x512x128xbf16, #tpu.memory_space<vmem>>, vector<1x512x128xbf16>
    %9 = vector.shape_cast %8 : vector<1x512x128xbf16> to vector<512x128xbf16>
    %10 = vector.shape_cast %7 : vector<512x128xbf16> to vector<1x512x128xbf16>
    tpu.vector_store %arg5[%c0_6, %c0_7, %c0_8], %10 {strides = array<i32>} : memref<1x512x128xbf16, #tpu.memory_space<vmem>>, vector<1x512x128xbf16>,
    %cst_9 = arith.constant dense<0.000000e+00> : vector<128xf32>
    %11 = vector.multi_reduction <add>, %6, %cst_9 [0] : vector<512x128xf32> to vector<128xf32>
    %12 = vector.shape_cast %11 : vector<128xf32> to vector<1x128xf32>
    %13 = arith.mulf %6, %6 : vector<512x128xf32>
    %cst_10 = arith.constant dense<0.000000e+00> : vector<128xf32>
    %14 = vector.multi_reduction <add>, %13, %cst_10 [0] : vector<512x128xf32> to vector<128xf32>
    %15 = vector.shape_cast %14 : vector<128xf32> to vector<1x128xf32>
    %16 = tpu.concatenate %12, %15 in 0 : vector<1x128xf32>, vector<1x128xf32> -> vector<2x128xf32>
    %c0_11 = arith.constant 0 : index
    %c0_12 = arith.constant 0 : index
    %c0_13 = arith.constant 0 : index
    %c0_14 = arith.constant 0 : index
    %17 = vector.load %arg6[%c0_11, %c0_12, %c0_13, %c0_14] : memref<1x1x2x128xf32, #tpu.memory_space<vmem>>, vector<1x1x2x128xf32>
    %18 = vector.shape_cast %17 : vector<1x1x2x128xf32> to vector<2x128xf32>
    %19 = vector.shape_cast %16 : vector<2x128xf32> to vector<1x1x2x128xf32>
    tpu.vector_store %arg6[%c0_11, %c0_12, %c0_13, %c0_14], %19 {strides = array<i32>} : memref<1x1x2x128xf32, #tpu.memory_space<vmem>>, vector<1x1x2x128xf32>,
    return
  }
  func.func @transform_0(%arg0: i32, %arg1: i32) -> (i32, i32, i32) {
    %c0_i32 = arith.constant 0 : i32
    %c0_i32_0 = arith.constant 0 : i32
    return %arg0, %arg1, %c0_i32 : i32, i32, i32
  }
  func.func @transform_1(%arg0: i32, %arg1: i32) -> (i32, i32) {
    %c0_i32 = arith.constant 0 : i32
    %c0_i32_0 = arith.constant 0 : i32
    %c0_i32_1 = arith.constant 0 : i32
    return %c0_i32, %c0_i32_0 : i32, i32
  }
  func.func @transform_2(%arg0: i32, %arg1: i32) -> (i32, i32) {
    %c0_i32 = arith.constant 0 : i32
    %c0_i32_0 = arith.constant 0 : i32
    %c0_i32_1 = arith.constant 0 : i32
    return %c0_i32, %c0_i32_0 : i32, i32
  }
  func.func @transform_3(%arg0: i32, %arg1: i32) -> (i32, i32, i32) {
    %c0_i32 = arith.constant 0 : i32
    %c0_i32_0 = arith.constant 0 : i32
    return %arg0, %arg1, %c0_i32 : i32, i32, i32
  }
  func.func @transform_4(%arg0: i32, %arg1: i32) -> (i32, i32, i32, i32) {
    %c0_i32 = arith.constant 0 : i32
    %c0_i32_0 = arith.constant 0 : i32
    %c0_i32_1 = arith.constant 0 : i32
    return %arg0, %arg1, %c0_i32, %c0_i32_0 : i32, i32, i32, i32
  }
}

</mosaic_0001>

<bundles_post_ra>
// kernel: tpu_custom_call.1
= control target key start
LH: loop header
LB: loop body
LE: loop exit
PB: predicated region body
PF: predicated region fallthrough
CT: control target
= control target key end

     0   :  { %10 = vsyncpa [#allocation3], 0  ;;  %s3108_s0 = inlined_call_operand.hbm [shape: bf16[2,512,128], index: 0, kind: input, shape index: {}]   ;;  %s3109_s1 = inlined_call_operand.hbm [shape: bf16[128,128], index: 1, kind: input, shape index: {}]   ;;  %s3110_s2 = inlined_call_operand.hbm [shape: f32[1,128], index: 2, kind: input, shape index: {}]   ;;  %s3111_s3 = inlined_call_operand.hbm [shape: bf16[2,512,128], index: 3, kind: output, shape index: {0}]   ;;  %s3112_s4 = inlined_call_operand.hbm [shape: f32[2,1,2,128], index: 4, kind: output, shape index: {1}]  }
   0x1   :  { %12 = vsyncpa [#allocation3 + $0x1], 0 }
   0x2   :  { %13 = vsyncpa [#allocation6], 0 }
   0x3   :  { %14 = vsyncpa [#allocation4], 0 }
   0x4   :  { %16 = vsyncpa [#allocation4 + $0x1], 0 }
   0x5   :  { %17 = vsyncpa [#allocation10], 0 }
   0x6   :  { %19 = vsyncpa [#allocation10 + $0x1], 0  ;;  %s2484_s15 = smov 0   ;;  %s2486_s16 = smov 0  }
   0x7   :  { %s2488_s17 = smov 0   ;;  %s2490_s18 = smov 0  }
   0x8   :  { %s2492_s19 = smov 0   ;;  %s2494_s20 = smov 0  }
   0x9 LB: > { %s1592_s21 = sadd.s32 4294967295, %s2448_s20   ;;  %s1593_s22 = sadd.s32 4294967294, %s2448_s20   ;;  %s2448_s20 = sphi %s2494_s20, %s25_s20   ;;  %s2444_s19 = sphi %s2492_s19, %s3134_s19   ;;  %s2440_s18 = sphi %s2490_s18, %s3133_s18   ;;  %s2436_s17 = sphi %s2488_s17, %s3132_s17   ;;  %s2432_s16 = sphi %s2486_s16, %s3131_s16   ;;  %s2428_s15 = sphi %s2484_s15, %s3130_s15  }
   0xa   : > { %p59_p0 = scmp.ne.s32.totalorder %s2432_s16, %s2428_s15  ;;  %p2518_p1 = scmp.eq.s32.totalorder %s1592_s21, 0 }
   0xb   : > { %p2522_p2 = scmp.eq.s32.totalorder %s1592_s21, 1  ;;  %p133_p3 = scmp.eq.s32.totalorder %s1593_s22, 1 }
   0xc   : > { %s3117_s23 = scalar_select %p2518_p1, 1, 0 }
   0xd   : > { %p2528_p4 = por %p2518_p1, %p59_p0  ;;  %p1594_p5 = scmp.ge.s32.totalorder %s2448_s20, 1 }
   0xe   : > { %p2533_p6 = por %p133_p3, %p59_p0  ;;  %p168_p7 = scmp.lt.s32.totalorder %s2448_s20, 3 }
   0xf   : > { %s3119_s25 = scalar_select %p2528_p4, 1, 0 }
  0x10   : > { %s3120_s26 = scalar_select %p2533_p6, 1, 0 }
  0x11   : > { %p2538_p8 = pnand %p1594_p5, %p168_p7  ;;  %s2450_s28 = smov [#allocation5]  }
  0x12   : > { %s180_s29 = sshll.u32 %s2450_s28, 4  ;;  %s2451_s5 = smov [#allocation7]   ;;  %s2542_s29 = int_to_ptr.vmem [resolvable:$true] %s180_s29 }
  0x13   : > { %p2126_p9 = pneg %p2538_p8  ;;  %s194_s6 = sshll.u32 %s2451_s5, 4  ;;  %s2553_s6 = int_to_ptr.vmem [resolvable:$true] %s194_s6 }
  0x14   : > { %s2244_s9 = scalar_lea.hbm %s3109_s1, 1024 }
  0x15   : > { %p2549_p11 = pnand %p2126_p9, %p2518_p1  ;;  %p2245_p12 = scmp.ne.s32.totalorder %s3109_s1, %s2244_s9 }
  0x16   : > { %p2251_p5 = scmp.lt.u32.totalorder %s2244_s9, %s3109_s1 }
  0x17   : > { %p2246_p13 = pneg %p2549_p11 }
  0x19   : > { %p2247_p0 = pnand %p2246_p13, %p2245_p12 }
  0x1b   : > { %p2248_p3 = pneg %p2247_p0 }
  0x1d   : > { %p2253_p7 = pnand %p2251_p5, %p2248_p3 }
  0x1f   : > { %2256 = shalt.err (!%p2253_p7)
}
  0x20   : > { %s2257_s14 = scalar_lea.vmem %s2542_s29, 1024  ;;  %p2265_p1 = scmp.lt.s32.totalorder %s2542_s29, %s2542_s29 }
  0x21   : > { %p2258_p9 = scmp.ne.s32.totalorder %s2542_s29, %s2257_s14  ;;  %p2266_p12 = scmp.lt.s32.totalorder %s2257_s14, %s2257_s14 }
  0x23   : > { %p2260_p10 = pnand %p2258_p9, %p2246_p13  ;;  %p2267_p0 = por %p2266_p12, %p2265_p1 }
  0x25   : > { %p2261_p6 = pneg %p2260_p10 }
  0x27   : > { %p2268_p4 = pnand %p2267_p0, %p2261_p6 }
  0x29   : > { %2271 = shalt.err (!%p2268_p4)
}
  0x2a   : > { %s2452_s21 = smov 64   ;;  %s2453_s22 = smov 4  }
  0x2b   : > { %2129 = dma.hbm_to_vmem [thread:$0]  (!%p2549_p11), %s3109_s1, 1024, %s2542_s29, [#allocation6], %s2452_s21, %s2452_s21, %s2453_s22  }
  0x2c   : > { %s2272_s9 = scalar_lea.hbm %s3110_s2, 16 }
  0x2d   : > { %p2273_p1 = scmp.ne.s32.totalorder %s3110_s2, %s2272_s9  ;;  %p2279_p10 = scmp.lt.u32.totalorder %s2272_s9, %s3110_s2 }
  0x2f   : > { %p2275_p4 = pnand %p2273_p1, %p2246_p13 }
  0x31   : > { %p2276_p6 = pneg %p2275_p4 }
  0x33   : > { %p2281_p3 = pnand %p2279_p10, %p2276_p6 }
  0x35   : > { %2284 = shalt.err (!%p2281_p3)
}
  0x36   : > { %s2285_s29 = scalar_lea.vmem %s2553_s6, 16  ;;  %s2292_s14 = scalar_lea.vmem %s2553_s6, 32 }
  0x37   : > { %p2286_p5 = scmp.ne.s32.totalorder %s2553_s6, %s2285_s29  ;;  %p2293_p12 = scmp.lt.s32.totalorder %s2553_s6, %s2553_s6 }
  0x38   : > { %p2294_p0 = scmp.lt.s32.totalorder %s2292_s14, %s2285_s29 }
  0x39   : > { %p2288_p7 = pnand %p2286_p5, %p2246_p13 }
  0x3a   : > { %p2295_p1 = por %p2294_p0, %p2293_p12 }
  0x3b   : > { %p2289_p9 = pneg %p2288_p7 }
  0x3d   : > { %p2296_p4 = pnand %p2295_p1, %p2289_p9 }
  0x3f   : > { %2299 = shalt.err (!%p2296_p4)
}
  0x40   : > { %2132 = dma.hbm_to_vmem [thread:$0]  (!%p2549_p11), %s3110_s2, 16, %s2553_s6, [#allocation6]  }
  0x41   : > { %s37_s7 = sadd.s32 1, %s2444_s19  ;;  %s46_s8 = sadd.s32 1, %s2436_s17 }
  0x42   : > { %p39_p13 = scmp.ge.s32.totalorder %s37_s7, 2  ;;  %p53_p6 = scmp.ne.s32.totalorder %s2436_s17, %s2432_s16 }
  0x43   : > { %p54_p10 = scmp.eq.s32.totalorder %s2448_s20, 0  ;;  %p2146_p3 = scmp.lt.s32.totalorder %s2448_s20, 2 }
  0x44   : > { %s3136_s7 = smov (%p39_p13, %s37_s7), 0  ;;  %p2621_p7 = por %p2522_p2, %p53_p6 }
  0x45   : > { %p55_p5 = por %p54_p10, %p53_p6  ;;  %s41_s9 = ssub.s32 %s2444_s19, %s3136_s7 }
  0x46   : > { %s3123_s30 = scalar_select %p2621_p7, 1, 0 }
  0x47   : > { %s205_s10 = sand.u32 1, %s2436_s17   ;;  %p44_p9 = scmp.eq.s32.totalorder %s41_s9, 0 }
  0x48   : > { %s1598_s6 = sshll.u32 %s205_s10, 8  ;;  %s1719_s11 = sshll.u32 %s2444_s19, 12 }
  0x49   : > { %s2630_s12 = scalar_select %p44_p9, %s2436_s17, %s46_s8  }
  0x4a   : > { %s2635_s14 = scalar_lea.hbm %s3108_s0, %s1719_s11  ;;  %s209_s24 = scalar_lea.vmem [#allocation2], %s1598_s6 }
  0x4b   : > { %s218_s28 = sshll.u32 %s209_s24, 4  ;;  %p2639_p2 = pnand %p2146_p3, %p55_p5  ;;  %s2643_s28 = int_to_ptr.vmem [resolvable:$true] %s218_s28 }
  0x4c   : > { %s2645_s8 = scalar_lea.sflag [#allocation3], %s205_s10  ;;  %s2300_s9 = scalar_lea.hbm %s2635_s14, 4096 }
  0x4d   : > { %p2301_p11 = scmp.ne.s32.totalorder %s2635_s14, %s2300_s9  ;;  %p2302_p12 = pneg %p2639_p2 }
  0x4e   : > { %s2305_s13 = scalar_lea.hbm %s3108_s0, 8192  ;;  %p2306_p4 = scmp.lt.u32.totalorder %s2635_s14, %s3108_s0 }
  0x4f   : > { %p2303_p0 = pnand %p2302_p12, %p2301_p11  ;;  %p2307_p13 = scmp.lt.u32.totalorder %s2305_s13, %s2300_s9 }
  0x50   : > { %p2309_p10 = scmp.lt.u32.totalorder %s2300_s9, %s2635_s14 }
  0x51   : > { %p2304_p1 = pneg %p2303_p0  ;;  %p2308_p6 = por %p2307_p13, %p2306_p4 }
  0x53   : > { %p2310_p3 = por %p2309_p10, %p2308_p6 }
  0x55   : > { %p2311_p5 = pnand %p2310_p3, %p2304_p1 }
  0x57   : > { %2314 = shalt.err (!%p2311_p5)
}
  0x58   : > { %s2315_s10 = scalar_lea.vmem %s2643_s28, 4096  ;;  %s2454_s6 = smov [#allocation2]  }
  0x59   : > { %p2316_p9 = scmp.ne.s32.totalorder %s2643_s28, %s2315_s10  ;;  %s2320_s11 = sshll.u32 %s2454_s6, 4  ;;  %s2321_s11 = int_to_ptr.vmem [resolvable:$false] %s2320_s11 }
  0x5a   : > { %s2322_s29 = scalar_lea.vmem %s2321_s11, 8192  ;;  %p2323_p7 = scmp.lt.s32.totalorder %s2643_s28, %s2321_s11 }
  0x5b   : > { %p2318_p11 = pnand %p2316_p9, %p2302_p12  ;;  %p2324_p4 = scmp.lt.s32.totalorder %s2322_s29, %s2315_s10 }
  0x5d   : > { %p2319_p0 = pneg %p2318_p11  ;;  %p2325_p13 = por %p2324_p4, %p2323_p7 }
  0x5f   : > { %p2326_p6 = pnand %p2325_p13, %p2319_p0 }
  0x61   : > { %2329 = shalt.err (!%p2326_p6)
}
  0x62   : > { %2136 = dma.hbm_to_vmem [thread:$0]  (!%p2639_p2), %s2635_s14, 4096, %s2643_s28, %s2645_s8, %s2452_s21, %s2452_s21, %s2453_s22  }
  0x63   : > { %230 = sbr.rel (%p2538_p8) target bundleno = 526 (0x20e), region = 32  ;;  %s2679_s9 = sand.u32 (!%p2538_p8), 1, %s2432_s16  }
  0x64   : > { %s1602_s13 = sshll.u32 (!%p2538_p8), %s2679_s9, 8  ;;  %s233_s24 = scalar_lea.sflag (!%p2538_p8), [#allocation3], %s2679_s9 }
  0x65   : > { %s2685_s5 = scalar_lea.vmem (!%p2538_p8), [#allocation2], %s1602_s13  ;;  %p3125_p7 = scmp.ne.s32.totalorder (!%p2538_p8), %s3119_s25, 0 }
  0x6a   : > { %2411 = dma.done.wait (%p3125_p7), %s233_s24, 4096  }
  0x6b   : > { %2413 = vsyncadd (%p3125_p7), %s233_s24, 4294963200  ;;  %p3126_p2 = scmp.ne.s32.totalorder %s3117_s23, 0 }
  0x6d   : > { %2415 = dma.done.wait (%p3126_p2), [#allocation6], 1040  }
  0x6e   : > { %2417 = vsyncadd (%p3126_p2), [#allocation6], 4294966256  ;;  %v2204_v0 = vld [vmem:[#allocation5] sm:$0xff]   ;;  %v2205_v1 = vld [vmem:[#allocation5 + $0x8] sm:$0xff]   ;;  %s2751_s23 = scalar_lea.vmem [#allocation8], %s1602_s13  ;;  %s1784_s25 = sshll.u32 %s2440_s18, 12 }
  0x6f   : > { %2016 = vmatprep.subr.bf16.mxu0 %v2204_v0  ;;  %2096 = vmatprep.subr.bf16.mxu1 %v2204_v0  ;;  %v2206_v2 = vld [vmem:[#allocation5 + $0x10] sm:$0xff]   ;;  %v2207_v3 = vld [vmem:[#allocation5 + $0x18] sm:$0xff]   ;;  %v2212_v4 = vld [vmem:[%s2685_s5] sm:$0xff]   ;;  %s1439_s27 = sshll.u32 %s2751_s23, 4  ;;  %s2927_s14 = scalar_lea.hbm %s3111_s3, %s1784_s25  ;;  %s2929_s27 = int_to_ptr.vmem [resolvable:$true] %s1439_s27 }
  0x70   : > { %2017 = vmatpush3.bf16.msra.mxu0 %v2204_v0  ;;  %2104 = vmatpush3.bf16.msra.mxu1 %v2204_v0  ;;  %v2208_v5 = vld [vmem:[#allocation5 + $0x20] sm:$0xff]   ;;  %v2209_v6 = vld [vmem:[#allocation5 + $0x28] sm:$0xff]   ;;  %v2210_v7 = vld [vmem:[#allocation5 + $0x30] sm:$0xff]   ;;  %s1419_s28 = scalar_lea.sflag [#allocation4], %s2679_s9  ;;  %s2330_s8 = scalar_lea.vmem %s2929_s27, 4096 }
  0x71   : > { %2018 = vmatprep.subr.bf16.mxu0 %v2205_v1  ;;  %2097 = vmatprep.subr.bf16.mxu1 %v2205_v1  ;;  %v2211_v8 = vld [vmem:[#allocation5 + $0x38] sm:$0xff]   ;;  %v2228_v9 = vld [vmem:[%s2685_s5 + $0x80] sm:$0xff]   ;;  %v2213_v10 = vld [vmem:[%s2685_s5 + $0x8] sm:$0xff]   ;;  %p2331_p8 = scmp.ne.s32.totalorder %s2929_s27, %s2330_s8  ;;  %p3127_p12 = scmp.ne.s32.totalorder %s3123_s30, 0 }
  0x72   : > { %2032 = vmatprep.mubr.bf16.mxu0 %v2212_v4  ;;  %2064 = vmatprep.mubr.bf16.mxu1 %v2228_v9  ;;  %v2214_v11 = vld [vmem:[%s2685_s5 + $0x10] sm:$0xff]   ;;  %v2229_v12 = vld [vmem:[%s2685_s5 + $0x88] sm:$0xff]   ;;  %v2215_v14 = vld [vmem:[%s2685_s5 + $0x18] sm:$0xff]   ;;  %s2455_s10 = smov [#allocation8]  }
  0x73   : > { %v2230_v13 = vld [vmem:[%s2685_s5 + $0x90] sm:$0xff]   ;;  %v2216_v15 = vld [vmem:[%s2685_s5 + $0x20] sm:$0xff]   ;;  %v2231_v16 = vld [vmem:[%s2685_s5 + $0x98] sm:$0xff]   ;;  %p2332_p1 = pnand %p2331_p8, %p3127_p12  ;;  %s2334_s6 = sshll.u32 %s2455_s10, 4  ;;  %s2335_s6 = int_to_ptr.vmem [resolvable:$false] %s2334_s6 }
  0x74   : > { %2019 = vmatpush3.bf16.msra.mxu0 %v2205_v1  ;;  %2105 = vmatpush3.bf16.msra.mxu1 %v2205_v1  ;;  %v2232_v17 = vld [vmem:[%s2685_s5 + $0xa0] sm:$0xff]   ;;  %v2217_v18 = vld [vmem:[%s2685_s5 + $0x28] sm:$0xff]   ;;  %v2218_v20 = vld [vmem:[%s2685_s5 + $0x30] sm:$0xff]   ;;  %s2336_s11 = scalar_lea.vmem %s2335_s6, 8192  ;;  %p2337_p3 = scmp.lt.s32.totalorder %s2929_s27, %s2335_s6 }
  0x75   : > { %2020 = vmatprep.subr.bf16.mxu0 %v2206_v2  ;;  %2098 = vmatprep.subr.bf16.mxu1 %v2206_v2  ;;  %v2233_v19 = vld [vmem:[%s2685_s5 + $0xa8] sm:$0xff]   ;;  %v2234_v21 = vld [vmem:[%s2685_s5 + $0xb0] sm:$0xff]   ;;  %v2219_v22 = vld [vmem:[%s2685_s5 + $0x38] sm:$0xff]   ;;  %p2333_p10 = pneg %p2332_p1  ;;  %p2338_p5 = scmp.lt.s32.totalorder %s2336_s11, %s2330_s8 }
  0x76   : > { %v2235_v23 = vld [vmem:[%s2685_s5 + $0xb8] sm:$0xff]   ;;  %v2220_v24 = vld [vmem:[%s2685_s5 + $0x40] sm:$0xff]   ;;  %v2221_v26 = vld [vmem:[%s2685_s5 + $0x48] sm:$0xff]  }
  0x77   : > { %v2236_v25 = vld [vmem:[%s2685_s5 + $0xc0] sm:$0xff]   ;;  %v2237_v27 = vld [vmem:[%s2685_s5 + $0xc8] sm:$0xff]   ;;  %v2222_v28 = vld [vmem:[%s2685_s5 + $0x50] sm:$0xff]   ;;  %p2339_p9 = por %p2338_p5, %p2337_p3 }
  0x78   : > { %2021 = vmatpush3.bf16.msra.mxu0 %v2206_v2  ;;  %2106 = vmatpush3.bf16.msra.mxu1 %v2206_v2  ;;  %v2238_v29 = vld [vmem:[%s2685_s5 + $0xd0] sm:$0xff]   ;;  %v2223_v30 = vld [vmem:[%s2685_s5 + $0x58] sm:$0xff]   ;;  %v2224_v32 = vld [vmem:[%s2685_s5 + $0x60] sm:$0xff]  }
  0x79   : > { %2022 = vmatprep.subr.bf16.mxu0 %v2207_v3  ;;  %2099 = vmatprep.subr.bf16.mxu1 %v2207_v3  ;;  %v2239_v31 = vld [vmem:[%s2685_s5 + $0xd8] sm:$0xff]   ;;  %v2240_v33 = vld [vmem:[%s2685_s5 + $0xe0] sm:$0xff]   ;;  %v2225_v34 = vld [vmem:[%s2685_s5 + $0x68] sm:$0xff]   ;;  %p2340_p11 = pnand %p2339_p9, %p2333_p10 }
  0x7a   : > { %v2241_v35 = vld [vmem:[%s2685_s5 + $0xe8] sm:$0xff]   ;;  %v2226_v36 = vld [vmem:[%s2685_s5 + $0x70] sm:$0xff]   ;;  %v2227_v38 = vld [vmem:[%s2685_s5 + $0x78] sm:$0xff]  }
  0x7b   : > { %v2242_v37 = vld [vmem:[%s2685_s5 + $0xf0] sm:$0xff]   ;;  %v2243_v39 = vld [vmem:[%s2685_s5 + $0xf8] sm:$0xff]   ;;  %v2727_v40 = vld [vmem:[#allocation7] ss:$0 sm:$0xff] }
  0x7c   : > { %2023 = vmatpush3.bf16.msra.mxu0 %v2207_v3  ;;  %2107 = vmatpush3.bf16.msra.mxu1 %v2207_v3 }
  0x7d   : > { %2024 = vmatprep.subr.bf16.mxu0 %v2208_v5  ;;  %2100 = vmatprep.subr.bf16.mxu1 %v2208_v5 }
  0x80   : > { %2025 = vmatpush3.bf16.msra.mxu0 %v2208_v5  ;;  %2108 = vmatpush3.bf16.msra.mxu1 %v2208_v5 }
  0x81   : > { %2026 = vmatprep.subr.bf16.mxu0 %v2209_v6  ;;  %2101 = vmatprep.subr.bf16.mxu1 %v2209_v6 }
  0x84   : > { %2027 = vmatpush3.bf16.msra.mxu0 %v2209_v6  ;;  %2109 = vmatpush3.bf16.msra.mxu1 %v2209_v6 }
  0x85   : > { %2028 = vmatprep.subr.bf16.mxu0 %v2210_v7  ;;  %2102 = vmatprep.subr.bf16.mxu1 %v2210_v7 }
  0x88   : > { %2029 = vmatpush3.bf16.msra.mxu0 %v2210_v7  ;;  %2110 = vmatpush3.bf16.msra.mxu1 %v2210_v7 }
  0x89   : > { %2030 = vmatprep.subr.bf16.mxu0 %v2211_v8  ;;  %2103 = vmatprep.subr.bf16.mxu1 %v2211_v8 }
  0x8c   : > { %2031 = vmatpush3.bf16.msra.mxu0 %v2211_v8  ;;  %2111 = vmatpush3.bf16.msra.mxu1 %v2211_v8 }
  0x8f   : > { %2033 = vmatmul.mubr.bf16.vlgmr.msra.gmra.mrb[0].mxu0 %v2213_v10  ;;  %2065 = vmatmul.mubr.bf16.vlgmr.msra.gmra.mrb[0].mxu1 %v2229_v12 }
  0x90   : > { %2036 = vmatprep.mubr.bf16.mxu0 %v2214_v11  ;;  %2068 = vmatprep.mubr.bf16.mxu1 %v2230_v13 }
  0x97   : > { %2037 = vmatmul.mubr.bf16.gmra.mrb[4].mxu0 %v2215_v14  ;;  %2069 = vmatmul.mubr.bf16.gmra.mrb[4].mxu1 %v2231_v16 }
  0x98   : > { %2040 = vmatprep.mubr.bf16.mxu0 %v2216_v15  ;;  %2072 = vmatprep.mubr.bf16.mxu1 %v2232_v17 }
  0x9f   : > { %2041 = vmatmul.mubr.bf16.gmra.mrb[8].mxu0 %v2217_v18  ;;  %2073 = vmatmul.mubr.bf16.gmra.mrb[8].mxu1 %v2233_v19 }
  0xa0   : > { %2044 = vmatprep.mubr.bf16.mxu0 %v2218_v20  ;;  %2076 = vmatprep.mubr.bf16.mxu1 %v2234_v21 }
  0xa7   : > { %2045 = vmatmul.mubr.bf16.gmra.mrb[12].mxu0 %v2219_v22  ;;  %2077 = vmatmul.mubr.bf16.gmra.mrb[12].mxu1 %v2235_v23 }
  0xa8   : > { %2048 = vmatprep.mubr.bf16.mxu0 %v2220_v24  ;;  %2080 = vmatprep.mubr.bf16.mxu1 %v2236_v25 }
  0xaf   : > { %2049 = vmatmul.mubr.bf16.gmra.mrb[16].mxu0 %v2221_v26  ;;  %2081 = vmatmul.mubr.bf16.gmra.mrb[16].mxu1 %v2237_v27 }
  0xb0   : > { %2052 = vmatprep.mubr.bf16.mxu0 %v2222_v28  ;;  %2084 = vmatprep.mubr.bf16.mxu1 %v2238_v29 }
  0xb7   : > { %2053 = vmatmul.mubr.bf16.gmra.mrb[20].mxu0 %v2223_v30  ;;  %2085 = vmatmul.mubr.bf16.gmra.mrb[20].mxu1 %v2239_v31 }
  0xb8   : > { %2056 = vmatprep.mubr.bf16.mxu0 %v2224_v32  ;;  %2088 = vmatprep.mubr.bf16.mxu1 %v2240_v33 }
  0xbf   : > { %2057 = vmatmul.mubr.bf16.gmra.mrb[24].mxu0 %v2225_v34  ;;  %2089 = vmatmul.mubr.bf16.gmra.mrb[24].mxu1 %v2241_v35 }
  0xc0   : > { %2060 = vmatprep.mubr.bf16.mxu0 %v2226_v36  ;;  %2092 = vmatprep.mubr.bf16.mxu1 %v2242_v37 }
  0xc7   : > { %2061 = vmatmul.mubr.bf16.gmra.mrb[28].mxu0 %v2227_v38  ;;  %2093 = vmatmul.mubr.bf16.gmra.mrb[28].mxu1 %v2243_v39 }
 0x162   : > { %v2034_v41 = vpop.f32.mrb[0].mxu0  ;;  %v2066_v42 = vpop.f32.mrb[0].mxu1 }
 0x163   : > { %v638_v43 = vpop.f32.mrb[1].mxu0  ;;  %v2730_v44 = vadd.f32 %v2066_v42, %v2727_v40  ;;  %v766_v45 = vpop.f32.mrb[1].mxu1  ;;  %v647_v50 = vadd.f32 %v2034_v41, %v2727_v40 }
 0x164   : > { %v639_v46 = vadd.f32 %v2727_v40, %v638_v43  ;;  %v2035_v47 = vpop.f32.mrb[2].mxu0  ;;  %v2734_v48 = vadd.f32 %v2727_v40, %v766_v45  ;;  %v2067_v49 = vpop.f32.mrb[2].mxu1 }
 0x165   : > { %v650_v51 = vadd.f32 %v2035_v47, %v2727_v40  ;;  %v641_v52 = vpop.f32.mrb[3].mxu0  ;;  %v2739_v53 = vadd.f32 %v2067_v49, %v2727_v40  ;;  %v769_v54 = vpop.f32.mrb[3].mxu1  ;;  %v1284_v0 = vmul.f32 %v647_v50, %v647_v50 }
 0x166   : > { %v642_v55 = vadd.f32 %v2727_v40, %v641_v52  ;;  %v2743_v56 = vadd.f32 %v2727_v40, %v769_v54  ;;  %v1282_v57 = vmul.f32 %v639_v46, %v639_v46 }
 0x167   : > { %v1793_v58 = vpack.c.bf16 %v650_v51, %v647_v50  ;;  %v1873_v59 = vpack.c.bf16 %v2739_v53, %v2730_v44  ;;  %v1285_v8 = vmul.f32 %v650_v51, %v650_v51 }
 0x168   : > { %v1788_v60 = vpack.c.bf16 %v642_v55, %v639_v46  ;;  %v1213_v61 = vadd.f32 %v642_v55, %v639_v46  ;;  %v1283_v62 = vmul.f32 %v642_v55, %v642_v55  ;;  %v1868_v63 = vpack.c.bf16 %v2743_v56, %v2734_v48 }
 0x169   : > { %1945 = vst [vmem:[%s2751_s23 + $0x8] sm:$0xff] %v1793_v58   ;;  %1961 = vst [vmem:[%s2751_s23 + $0x88] sm:$0xff] %v1873_v59  }
 0x16a   : > { %1789 = vst [vmem:[%s2751_s23] sm:$0xff] %v1788_v60   ;;  %v1214_v1 = vadd.f32 %v1213_v61, %v647_v50  ;;  %v1346_v2 = vadd.f32 %v1283_v62, %v1282_v57  ;;  %v2038_v3 = vpop.f32.mrb[4].mxu0  ;;  %1960 = vst [vmem:[%s2751_s23 + $0x80] sm:$0xff] %v1868_v63   ;;  %v2070_v4 = vpop.f32.mrb[4].mxu1 }
 0x16b   : > { %v654_v5 = vpop.f32.mrb[5].mxu0  ;;  %v2758_v6 = vadd.f32 %v2070_v4, %v2727_v40  ;;  %v782_v7 = vpop.f32.mrb[5].mxu1  ;;  %v663_v14 = vadd.f32 %v2038_v3, %v2727_v40 }
 0x16c   : > { %v1347_v9 = vadd.f32 %v1346_v2, %v1284_v0  ;;  %v655_v10 = vadd.f32 %v2727_v40, %v654_v5  ;;  %v1215_v11 = vadd.f32 %v1214_v1, %v650_v51  ;;  %v2039_v12 = vpop.f32.mrb[6].mxu0  ;;  %v2071_v13 = vpop.f32.mrb[6].mxu1  ;;  %v2768_v24 = vadd.f32 %v2727_v40, %v782_v7 }
 0x16d   : > { %v666_v15 = vadd.f32 %v2039_v12, %v2727_v40  ;;  %v657_v16 = vpop.f32.mrb[7].mxu0  ;;  %v2764_v17 = vadd.f32 %v2071_v13, %v2727_v40  ;;  %v785_v18 = vpop.f32.mrb[7].mxu1  ;;  %v1288_v31 = vmul.f32 %v663_v14, %v663_v14 }
 0x16e   : > { %v1216_v19 = vadd.f32 %v1215_v11, %v655_v10  ;;  %v1286_v20 = vmul.f32 %v655_v10, %v655_v10  ;;  %v1348_v21 = vadd.f32 %v1347_v9, %v1285_v8  ;;  %v658_v22 = vadd.f32 %v2727_v40, %v657_v16 }
 0x16f   : > { %v1803_v23 = vpack.c.bf16 %v666_v15, %v663_v14  ;;  %v1883_v25 = vpack.c.bf16 %v2764_v17, %v2758_v6  ;;  %v2775_v30 = vadd.f32 %v2727_v40, %v785_v18  ;;  %v1289_v41 = vmul.f32 %v666_v15, %v666_v15 }
 0x170   : > { %v1349_v26 = vadd.f32 %v1348_v21, %v1286_v20  ;;  %v1798_v27 = vpack.c.bf16 %v658_v22, %v655_v10  ;;  %v1217_v28 = vadd.f32 %v1216_v19, %v658_v22  ;;  %v1287_v29 = vmul.f32 %v658_v22, %v658_v22 }
 0x171   : > { %1947 = vst [vmem:[%s2751_s23 + $0x18] sm:$0xff] %v1803_v23   ;;  %1963 = vst [vmem:[%s2751_s23 + $0x98] sm:$0xff] %v1883_v25   ;;  %v1878_v37 = vpack.c.bf16 %v2775_v30, %v2768_v24 }
 0x172   : > { %1946 = vst [vmem:[%s2751_s23 + $0x10] sm:$0xff] %v1798_v27   ;;  %v1218_v32 = vadd.f32 %v1217_v28, %v663_v14  ;;  %v1350_v33 = vadd.f32 %v1349_v26, %v1287_v29  ;;  %v2042_v34 = vpop.f32.mrb[8].mxu0  ;;  %v2074_v35 = vpop.f32.mrb[8].mxu1 }
 0x173   : > { %v670_v36 = vpop.f32.mrb[9].mxu0  ;;  %v2781_v38 = vadd.f32 %v2074_v35, %v2727_v40  ;;  %v798_v39 = vpop.f32.mrb[9].mxu1  ;;  %v679_v49 = vadd.f32 %v2042_v34, %v2727_v40  ;;  %1962 = vst [vmem:[%s2751_s23 + $0x90] sm:$0xff] %v1878_v37  }
 0x174   : > { %v1351_v42 = vadd.f32 %v1350_v33, %v1288_v31  ;;  %v671_v43 = vadd.f32 %v2727_v40, %v670_v36  ;;  %v1219_v45 = vadd.f32 %v1218_v32, %v666_v15  ;;  %v2043_v46 = vpop.f32.mrb[10].mxu0  ;;  %v2075_v47 = vpop.f32.mrb[10].mxu1  ;;  %v2792_v61 = vadd.f32 %v2727_v40, %v798_v39 }
 0x175   : > { %v682_v50 = vadd.f32 %v2043_v46, %v2727_v40  ;;  %v673_v51 = vpop.f32.mrb[11].mxu0  ;;  %v2788_v52 = vadd.f32 %v2075_v47, %v2727_v40  ;;  %v801_v54 = vpop.f32.mrb[11].mxu1  ;;  %v1292_v4 = vmul.f32 %v679_v49, %v679_v49 }
 0x176   : > { %v1220_v55 = vadd.f32 %v1219_v45, %v671_v43  ;;  %v1290_v57 = vmul.f32 %v671_v43, %v671_v43  ;;  %v1352_v58 = vadd.f32 %v1351_v42, %v1289_v41  ;;  %v674_v59 = vadd.f32 %v2727_v40, %v673_v51 }
 0x177   : > { %v1813_v60 = vpack.c.bf16 %v682_v50, %v679_v49  ;;  %v1893_v62 = vpack.c.bf16 %v2788_v52, %v2781_v38  ;;  %v2799_v3 = vadd.f32 %v2727_v40, %v801_v54  ;;  %v1293_v14 = vmul.f32 %v682_v50, %v682_v50 }
 0x178   : > { %v1353_v63 = vadd.f32 %v1352_v58, %v1290_v57  ;;  %v1808_v0 = vpack.c.bf16 %v674_v59, %v671_v43  ;;  %v1221_v1 = vadd.f32 %v1220_v55, %v674_v59  ;;  %v1291_v2 = vmul.f32 %v674_v59, %v674_v59 }
 0x179   : > { %1949 = vst [vmem:[%s2751_s23 + $0x28] sm:$0xff] %v1813_v60   ;;  %1965 = vst [vmem:[%s2751_s23 + $0xa8] sm:$0xff] %v1893_v62   ;;  %v1888_v11 = vpack.c.bf16 %v2799_v3, %v2792_v61 }
 0x17a   : > { %1948 = vst [vmem:[%s2751_s23 + $0x20] sm:$0xff] %v1808_v0   ;;  %v1222_v5 = vadd.f32 %v1221_v1, %v679_v49  ;;  %v1354_v7 = vadd.f32 %v1353_v63, %v1291_v2  ;;  %v2046_v8 = vpop.f32.mrb[12].mxu0  ;;  %v2078_v9 = vpop.f32.mrb[12].mxu1 }
 0x17b   : > { %v686_v10 = vpop.f32.mrb[13].mxu0  ;;  %v2805_v12 = vadd.f32 %v2078_v9, %v2727_v40  ;;  %v814_v13 = vpop.f32.mrb[13].mxu1  ;;  %v695_v21 = vadd.f32 %v2046_v8, %v2727_v40  ;;  %1964 = vst [vmem:[%s2751_s23 + $0xa0] sm:$0xff] %v1888_v11  }
 0x17c   : > { %v1355_v15 = vadd.f32 %v1354_v7, %v1292_v4  ;;  %v687_v16 = vadd.f32 %v2727_v40, %v686_v10  ;;  %v1223_v18 = vadd.f32 %v1222_v5, %v682_v50  ;;  %v2047_v19 = vpop.f32.mrb[14].mxu0  ;;  %v2079_v20 = vpop.f32.mrb[14].mxu1  ;;  %v2816_v33 = vadd.f32 %v2727_v40, %v814_v13 }
 0x17d   : > { %v698_v22 = vadd.f32 %v2047_v19, %v2727_v40  ;;  %v689_v23 = vpop.f32.mrb[15].mxu0  ;;  %v2812_v25 = vadd.f32 %v2079_v20, %v2727_v40  ;;  %v817_v26 = vpop.f32.mrb[15].mxu1  ;;  %v1296_v42 = vmul.f32 %v695_v21, %v695_v21 }
 0x17e   : > { %v1224_v27 = vadd.f32 %v1223_v18, %v687_v16  ;;  %v1294_v28 = vmul.f32 %v687_v16, %v687_v16  ;;  %v1356_v29 = vadd.f32 %v1355_v15, %v1293_v14  ;;  %v690_v31 = vadd.f32 %v2727_v40, %v689_v23 }
 0x17f   : > { %v1823_v32 = vpack.c.bf16 %v698_v22, %v695_v21  ;;  %v1903_v34 = vpack.c.bf16 %v2812_v25, %v2805_v12  ;;  %v2823_v41 = vadd.f32 %v2727_v40, %v817_v26  ;;  %v1297_v55 = vmul.f32 %v698_v22, %v698_v22 }
 0x180   : > { %v1357_v35 = vadd.f32 %v1356_v29, %v1294_v28  ;;  %v1818_v36 = vpack.c.bf16 %v690_v31, %v687_v16  ;;  %v1225_v37 = vadd.f32 %v1224_v27, %v690_v31  ;;  %v1295_v39 = vmul.f32 %v690_v31, %v690_v31 }
 0x181   : > { %1951 = vst [vmem:[%s2751_s23 + $0x38] sm:$0xff] %v1823_v32   ;;  %1967 = vst [vmem:[%s2751_s23 + $0xb8] sm:$0xff] %v1903_v34   ;;  %v1898_v50 = vpack.c.bf16 %v2823_v41, %v2816_v33 }
 0x182   : > { %1950 = vst [vmem:[%s2751_s23 + $0x30] sm:$0xff] %v1818_v36   ;;  %v1226_v43 = vadd.f32 %v1225_v37, %v695_v21  ;;  %v1358_v45 = vadd.f32 %v1357_v35, %v1295_v39  ;;  %v2050_v46 = vpop.f32.mrb[16].mxu0  ;;  %v2082_v47 = vpop.f32.mrb[16].mxu1 }
 0x183   : > { %v702_v49 = vpop.f32.mrb[17].mxu0  ;;  %v2829_v51 = vadd.f32 %v2082_v47, %v2727_v40  ;;  %v830_v54 = vpop.f32.mrb[17].mxu1  ;;  %v711_v63 = vadd.f32 %v2050_v46, %v2727_v40  ;;  %1966 = vst [vmem:[%s2751_s23 + $0xb0] sm:$0xff] %v1898_v50  }
 0x184   : > { %v1359_v57 = vadd.f32 %v1358_v45, %v1296_v42  ;;  %v703_v58 = vadd.f32 %v2727_v40, %v702_v49  ;;  %v1227_v59 = vadd.f32 %v1226_v43, %v698_v22  ;;  %v2051_v60 = vpop.f32.mrb[18].mxu0  ;;  %v2083_v62 = vpop.f32.mrb[18].mxu1  ;;  %v2840_v11 = vadd.f32 %v2727_v40, %v830_v54 }
 0x185   : > { %v714_v0 = vadd.f32 %v2051_v60, %v2727_v40  ;;  %v705_v1 = vpop.f32.mrb[19].mxu0  ;;  %v2836_v2 = vadd.f32 %v2083_v62, %v2727_v40  ;;  %v833_v4 = vpop.f32.mrb[19].mxu1  ;;  %v1300_v20 = vmul.f32 %v711_v63, %v711_v63 }
 0x186   : > { %v1228_v5 = vadd.f32 %v1227_v59, %v703_v58  ;;  %v1298_v7 = vmul.f32 %v703_v58, %v703_v58  ;;  %v1360_v8 = vadd.f32 %v1359_v57, %v1297_v55  ;;  %v706_v9 = vadd.f32 %v2727_v40, %v705_v1 }
 0x187   : > { %v1833_v10 = vpack.c.bf16 %v714_v0, %v711_v63  ;;  %v1913_v13 = vpack.c.bf16 %v2836_v2, %v2829_v51  ;;  %v2847_v19 = vadd.f32 %v2727_v40, %v833_v4  ;;  %v1301_v32 = vmul.f32 %v714_v0, %v714_v0 }
 0x188   : > { %v1361_v14 = vadd.f32 %v1360_v8, %v1298_v7  ;;  %v1828_v15 = vpack.c.bf16 %v706_v9, %v703_v58  ;;  %v1229_v16 = vadd.f32 %v1228_v5, %v706_v9  ;;  %v1299_v18 = vmul.f32 %v706_v9, %v706_v9 }
 0x189   : > { %1953 = vst [vmem:[%s2751_s23 + $0x48] sm:$0xff] %v1833_v10   ;;  %1969 = vst [vmem:[%s2751_s23 + $0xc8] sm:$0xff] %v1913_v13   ;;  %v1908_v28 = vpack.c.bf16 %v2847_v19, %v2840_v11 }
 0x18a   : > { %1952 = vst [vmem:[%s2751_s23 + $0x40] sm:$0xff] %v1828_v15   ;;  %v1230_v21 = vadd.f32 %v1229_v16, %v711_v63  ;;  %v1362_v22 = vadd.f32 %v1361_v14, %v1299_v18  ;;  %v2054_v23 = vpop.f32.mrb[20].mxu0  ;;  %v2086_v26 = vpop.f32.mrb[20].mxu1 }
 0x18b   : > { %v718_v27 = vpop.f32.mrb[21].mxu0  ;;  %v2853_v29 = vadd.f32 %v2086_v26, %v2727_v40  ;;  %v846_v31 = vpop.f32.mrb[21].mxu1  ;;  %v727_v42 = vadd.f32 %v2054_v23, %v2727_v40  ;;  %1968 = vst [vmem:[%s2751_s23 + $0xc0] sm:$0xff] %v1908_v28  }
 0x18c   : > { %v1363_v34 = vadd.f32 %v1362_v22, %v1300_v20  ;;  %v719_v35 = vadd.f32 %v2727_v40, %v718_v27  ;;  %v1231_v36 = vadd.f32 %v1230_v21, %v714_v0  ;;  %v2055_v37 = vpop.f32.mrb[22].mxu0  ;;  %v2087_v39 = vpop.f32.mrb[22].mxu1  ;;  %v2864_v58 = vadd.f32 %v2727_v40, %v846_v31 }
 0x18d   : > { %v730_v43 = vadd.f32 %v2055_v37, %v2727_v40  ;;  %v721_v45 = vpop.f32.mrb[23].mxu0  ;;  %v2860_v46 = vadd.f32 %v2087_v39, %v2727_v40  ;;  %v849_v47 = vpop.f32.mrb[23].mxu1  ;;  %v1304_v4 = vmul.f32 %v727_v42, %v727_v42 }
 0x18e   : > { %v1232_v49 = vadd.f32 %v1231_v36, %v719_v35  ;;  %v1302_v50 = vmul.f32 %v719_v35, %v719_v35  ;;  %v1364_v54 = vadd.f32 %v1363_v34, %v1301_v32  ;;  %v722_v55 = vadd.f32 %v2727_v40, %v721_v45 }
 0x18f   : > { %v1843_v57 = vpack.c.bf16 %v730_v43, %v727_v42  ;;  %v1923_v59 = vpack.c.bf16 %v2860_v46, %v2853_v29  ;;  %v2871_v1 = vadd.f32 %v2727_v40, %v849_v47  ;;  %v1305_v16 = vmul.f32 %v730_v43, %v730_v43 }
 0x190   : > { %v1365_v60 = vadd.f32 %v1364_v54, %v1302_v50  ;;  %v1838_v62 = vpack.c.bf16 %v722_v55, %v719_v35  ;;  %v1233_v63 = vadd.f32 %v1232_v49, %v722_v55  ;;  %v1303_v0 = vmul.f32 %v722_v55, %v722_v55 }
 0x191   : > { %1955 = vst [vmem:[%s2751_s23 + $0x58] sm:$0xff] %v1843_v57   ;;  %1971 = vst [vmem:[%s2751_s23 + $0xd8] sm:$0xff] %v1923_v59   ;;  %v1918_v13 = vpack.c.bf16 %v2871_v1, %v2864_v58 }
 0x192   : > { %1954 = vst [vmem:[%s2751_s23 + $0x50] sm:$0xff] %v1838_v62   ;;  %v1234_v5 = vadd.f32 %v1233_v63, %v727_v42  ;;  %v1366_v7 = vadd.f32 %v1365_v60, %v1303_v0  ;;  %v2058_v8 = vpop.f32.mrb[24].mxu0  ;;  %v2090_v9 = vpop.f32.mrb[24].mxu1 }
 0x193   : > { %v734_v10 = vpop.f32.mrb[25].mxu0  ;;  %v2877_v14 = vadd.f32 %v2090_v9, %v2727_v40  ;;  %v862_v15 = vpop.f32.mrb[25].mxu1  ;;  %v743_v26 = vadd.f32 %v2058_v8, %v2727_v40  ;;  %1970 = vst [vmem:[%s2751_s23 + $0xd0] sm:$0xff] %v1918_v13  }
 0x194   : > { %v1367_v18 = vadd.f32 %v1366_v7, %v1304_v4  ;;  %v735_v20 = vadd.f32 %v2727_v40, %v734_v10  ;;  %v1235_v21 = vadd.f32 %v1234_v5, %v730_v43  ;;  %v2059_v22 = vpop.f32.mrb[26].mxu0  ;;  %v2091_v23 = vpop.f32.mrb[26].mxu1  ;;  %v2888_v42 = vadd.f32 %v2727_v40, %v862_v15 }
 0x195   : > { %v746_v27 = vadd.f32 %v2059_v22, %v2727_v40  ;;  %v737_v28 = vpop.f32.mrb[27].mxu0  ;;  %v2884_v31 = vadd.f32 %v2091_v23, %v2727_v40  ;;  %v865_v32 = vpop.f32.mrb[27].mxu1  ;;  %v1308_v55 = vmul.f32 %v743_v26, %v743_v26 }
 0x196   : > { %v1236_v34 = vadd.f32 %v1235_v21, %v735_v20  ;;  %v1306_v35 = vmul.f32 %v735_v20, %v735_v20  ;;  %v1368_v36 = vadd.f32 %v1367_v18, %v1305_v16  ;;  %v738_v37 = vadd.f32 %v2727_v40, %v737_v28 }
 0x197   : > { %v1853_v39 = vpack.c.bf16 %v746_v27, %v743_v26  ;;  %v1933_v43 = vpack.c.bf16 %v2884_v31, %v2877_v14  ;;  %v2895_v54 = vadd.f32 %v2727_v40, %v865_v32  ;;  %v1309_v7 = vmul.f32 %v746_v27, %v746_v27 }
 0x198   : > { %v1369_v45 = vadd.f32 %v1368_v36, %v1306_v35  ;;  %v1848_v47 = vpack.c.bf16 %v738_v37, %v735_v20  ;;  %v1237_v49 = vadd.f32 %v1236_v34, %v738_v37  ;;  %v1307_v50 = vmul.f32 %v738_v37, %v738_v37 }
 0x199   : > { %1957 = vst [vmem:[%s2751_s23 + $0x68] sm:$0xff] %v1853_v39   ;;  %1973 = vst [vmem:[%s2751_s23 + $0xe8] sm:$0xff] %v1933_v43   ;;  %v1928_v0 = vpack.c.bf16 %v2895_v54, %v2888_v42 }
 0x19a   : > { %1956 = vst [vmem:[%s2751_s23 + $0x60] sm:$0xff] %v1848_v47   ;;  %v1238_v57 = vadd.f32 %v1237_v49, %v743_v26  ;;  %v1370_v59 = vadd.f32 %v1369_v45, %v1307_v50  ;;  %v2062_v60 = vpop.f32.mrb[28].mxu0  ;;  %v2094_v62 = vpop.f32.mrb[28].mxu1 }
 0x19b   : > { %v750_v63 = vpop.f32.mrb[29].mxu0  ;;  %v2901_v4 = vadd.f32 %v2094_v62, %v2727_v40  ;;  %v878_v5 = vpop.f32.mrb[29].mxu1  ;;  %v759_v16 = vadd.f32 %v2062_v60, %v2727_v40  ;;  %1972 = vst [vmem:[%s2751_s23 + $0xe0] sm:$0xff] %v1928_v0   ;;  %v1314_v60 = vmul.f32 %v2734_v48, %v2734_v48 }
 0x19c   : > { %v1371_v8 = vadd.f32 %v1370_v59, %v1308_v55  ;;  %v751_v9 = vadd.f32 %v2727_v40, %v750_v63  ;;  %v1239_v10 = vadd.f32 %v1238_v57, %v746_v27  ;;  %v2063_v13 = vpop.f32.mrb[30].mxu0  ;;  %v2095_v15 = vpop.f32.mrb[30].mxu1  ;;  %v2912_v34 = vadd.f32 %v2727_v40, %v878_v5 }
 0x19d   : > { %v762_v18 = vadd.f32 %v2063_v13, %v2727_v40  ;;  %v753_v20 = vpop.f32.mrb[31].mxu0  ;;  %v2908_v21 = vadd.f32 %v2095_v15, %v2727_v40  ;;  %v881_v22 = vpop.f32.mrb[31].mxu1  ;;  %v1312_v47 = vmul.f32 %v759_v16, %v759_v16 }
 0x19e   : > { %v1240_v23 = vadd.f32 %v1239_v10, %v751_v9  ;;  %v1310_v26 = vmul.f32 %v751_v9, %v751_v9  ;;  %v1372_v27 = vadd.f32 %v1371_v8, %v1309_v7  ;;  %v754_v28 = vadd.f32 %v2727_v40, %v753_v20 }
 0x19f   : > { %v1863_v32 = vpack.c.bf16 %v762_v18, %v759_v16  ;;  %v1943_v35 = vpack.c.bf16 %v2908_v21, %v2901_v4  ;;  %v2921_v45 = vadd.f32 %v2727_v40, %v881_v22  ;;  %v1313_v57 = vmul.f32 %v762_v18, %v762_v18 }
 0x1a0   : > { %v1373_v36 = vadd.f32 %v1372_v27, %v1310_v26  ;;  %v1858_v37 = vpack.c.bf16 %v754_v28, %v751_v9  ;;  %v1241_v39 = vadd.f32 %v1240_v23, %v754_v28  ;;  %v1311_v43 = vmul.f32 %v754_v28, %v754_v28 }
 0x1a1   : > { %1959 = vst [vmem:[%s2751_s23 + $0x78] sm:$0xff] %v1863_v32   ;;  %1975 = vst [vmem:[%s2751_s23 + $0xf8] sm:$0xff] %v1943_v35   ;;  %v1938_v55 = vpack.c.bf16 %v2921_v45, %v2912_v34 }
 0x1a2   : > { %1958 = vst [vmem:[%s2751_s23 + $0x70] sm:$0xff] %v1858_v37   ;;  %v1242_v49 = vadd.f32 %v1241_v39, %v759_v16  ;;  %v1374_v50 = vadd.f32 %v1373_v36, %v1311_v43 }
 0x1a3   : > { %1974 = vst [vmem:[%s2751_s23 + $0xf0] sm:$0xff] %v1938_v55  }
 0x1a4   : > { %v1375_v40 = vadd.f32 %v1374_v50, %v1312_v47  ;;  %v1243_v59 = vadd.f32 %v1242_v49, %v762_v18 }
 0x1a6   : > { %v1244_v62 = vadd.f32 %v1243_v59, %v2734_v48  ;;  %v1376_v63 = vadd.f32 %v1375_v40, %v1313_v57 }
 0x1a7   : > { %2343 = shalt.err (!%p2340_p11)
}
 0x1a8   : > { %s2344_s29 = scalar_lea.hbm %s2927_s14, 4096  ;;  %s2348_s5 = scalar_lea.hbm %s3111_s3, 8192 }
 0x1a9   : > { %p2345_p0 = scmp.ne.s32.totalorder %s2927_s14, %s2344_s29  ;;  %p2349_p6 = scmp.lt.u32.totalorder %s2927_s14, %s3111_s3 }
 0x1aa   : > { %p2350_p7 = scmp.lt.u32.totalorder %s2348_s5, %s2344_s29  ;;  %p2352_p8 = scmp.lt.u32.totalorder %s2344_s29, %s2927_s14 }
 0x1ab   : > { %p2346_p4 = pnand %p2345_p0, %p3127_p12 }
 0x1ac   : > { %p2351_p2 = por %p2350_p7, %p2349_p6 }
 0x1ad   : > { %p2347_p13 = pneg %p2346_p4 }
 0x1ae   : > { %p2353_p1 = por %p2352_p8, %p2351_p2 }
 0x1b0   : > { %p2354_p10 = pnand %p2353_p1, %p2347_p13 }
 0x1b2   : > { %2357 = shalt.err (!%p2354_p10)
}
 0x1b3   : > { %s2456_s21 = smov 64   ;;  %s2457_s22 = smov 4   ;;  %v1377_v48 = vadd.f32 %v1376_v63, %v1314_v60  ;;  %v1245_v0 = vadd.f32 %v1244_v62, %v2743_v56  ;;  %v1315_v5 = vmul.f32 %v2743_v56, %v2743_v56  ;;  %v1316_v7 = vmul.f32 %v2730_v44, %v2730_v44 }
 0x1b4   : > { %2122 = dma.vmem_to_hbm [thread:$0]  (%p3127_p12), %s2929_s27, 4096, %s2927_s14, %s1419_s28, %s2456_s21, %s2456_s21, %s2457_s22   ;;  %v1317_v10 = vmul.f32 %v2739_v53, %v2739_v53  ;;  %v1318_v16 = vmul.f32 %v2768_v24, %v2768_v24  ;;  %v1319_v23 = vmul.f32 %v2775_v30, %v2775_v30  ;;  %v1323_v39 = vmul.f32 %v2799_v3, %v2799_v3 }
 0x1b5   : > { %v1246_v8 = vadd.f32 %v1245_v0, %v2730_v44  ;;  %v1378_v9 = vadd.f32 %v1377_v48, %v1315_v5  ;;  %v1320_v44 = vmul.f32 %v2758_v6, %v2758_v6  ;;  %v1327_v59 = vmul.f32 %v2823_v41, %v2823_v41  ;;  %s1606_s27 = sshll.u32 %s2679_s9, 1  ;;  %s1716_s14 = sshll.u32 %s2440_s18, 5 }
 0x1b6   : > { %s273_s28 = scalar_lea.vmem [#allocation9], %s1606_s27  ;;  %vm1415_vm0 = vcmask 1040384   ;;  %s3059_s11 = scalar_lea.hbm %s3112_s4, %s1716_s14 }
 0x1b7   : > { %v1379_v13 = vadd.f32 %v1378_v9, %v1316_v7  ;;  %v1247_v15 = vadd.f32 %v1246_v8, %v2739_v53  ;;  %v1321_v53 = vmul.f32 %v2764_v17, %v2764_v17  ;;  %v1331_v8 = vmul.f32 %v2847_v19, %v2847_v19  ;;  %s1456_s8 = sshll.u32 %s273_s28, 4  ;;  %s1424_s29 = scalar_lea.sflag [#allocation10], %s2679_s9  ;;  %s3061_s8 = int_to_ptr.vmem [resolvable:$true] %s1456_s8 }
 0x1b8   : > { %s2358_s13 = scalar_lea.vmem %s3061_s8, 32  ;;  %s2458_s18 = smov [#allocation9]  }
 0x1b9   : > { %v1248_v18 = vadd.f32 %v1247_v15, %v2768_v24  ;;  %v1380_v20 = vadd.f32 %v1379_v13, %v1317_v10  ;;  %v1322_v24 = vmul.f32 %v2792_v61, %v2792_v61  ;;  %p2359_p3 = scmp.ne.s32.totalorder %s3061_s8, %s2358_s13  ;;  %s2362_s24 = sshll.u32 %s2458_s18, 4  ;;  %s2363_s24 = int_to_ptr.vmem [resolvable:$false] %s2362_s24 }
 0x1ba   : > { %s2364_s5 = scalar_lea.vmem %s2363_s24, 64  ;;  %p2365_p11 = scmp.lt.s32.totalorder %s3061_s8, %s2363_s24 }
 0x1bb   : > { %v1381_v22 = vadd.f32 %v1380_v20, %v1318_v16  ;;  %v1249_v56 = vadd.f32 %v1248_v18, %v2775_v30  ;;  %p2360_p5 = pnand %p2359_p3, %p3127_p12  ;;  %p2366_p0 = scmp.lt.s32.totalorder %s2364_s5, %s2358_s13 }
 0x1bd   : > { %v1250_v26 = vadd.f32 %v1249_v56, %v2758_v6  ;;  %v1382_v27 = vadd.f32 %v1381_v22, %v1319_v23  ;;  %v1324_v6 = vmul.f32 %v2781_v38, %v2781_v38  ;;  %v1335_v22 = vmul.f32 %v2871_v1, %v2871_v1  ;;  %p2361_p9 = pneg %p2360_p5  ;;  %p2367_p4 = por %p2366_p0, %p2365_p11 }
 0x1bf   : > { %v1383_v28 = vadd.f32 %v1382_v27, %v1320_v44  ;;  %v1251_v32 = vadd.f32 %v1250_v26, %v2764_v17  ;;  %v1325_v17 = vmul.f32 %v2788_v52, %v2788_v52  ;;  %p2368_p13 = pnand %p2367_p4, %p2361_p9 }
 0x1c1   : > { %v1252_v35 = vadd.f32 %v1251_v32, %v2792_v61  ;;  %v1384_v36 = vadd.f32 %v1383_v28, %v1321_v53  ;;  %v1326_v61 = vmul.f32 %v2816_v33, %v2816_v33  ;;  %v1339_v32 = vmul.f32 %v2895_v54, %v2895_v54 }
 0x1c3   : > { %v1385_v37 = vadd.f32 %v1384_v36, %v1322_v24  ;;  %v1253_v30 = vadd.f32 %v1252_v35, %v2799_v3 }
 0x1c5   : > { %v1254_v43 = vadd.f32 %v1253_v30, %v2781_v38  ;;  %v1386_v47 = vadd.f32 %v1385_v37, %v1323_v39  ;;  %v1328_v38 = vmul.f32 %v2805_v12, %v2805_v12 }
 0x1c7   : > { %v1387_v49 = vadd.f32 %v1386_v47, %v1324_v6  ;;  %v1255_v50 = vadd.f32 %v1254_v43, %v2788_v52  ;;  %v1329_v52 = vmul.f32 %v2812_v25, %v2812_v25  ;;  %v1344_v43 = vmul.f32 %v2901_v4, %v2901_v4 }
 0x1c9   : > { %v1256_v55 = vadd.f32 %v1255_v50, %v2816_v33  ;;  %v1388_v57 = vadd.f32 %v1387_v49, %v1325_v17  ;;  %v1330_v33 = vmul.f32 %v2840_v11, %v2840_v11 }
 0x1cb   : > { %v1389_v40 = vadd.f32 %v1388_v57, %v1326_v61  ;;  %v1257_v3 = vadd.f32 %v1256_v55, %v2823_v41 }
 0x1cd   : > { %v1258_v60 = vadd.f32 %v1257_v3, %v2805_v12  ;;  %v1390_v62 = vadd.f32 %v1389_v40, %v1327_v59  ;;  %v1332_v12 = vmul.f32 %v2829_v51, %v2829_v51 }
 0x1cf   : > { %v1391_v63 = vadd.f32 %v1390_v62, %v1328_v38  ;;  %v1259_v48 = vadd.f32 %v1258_v60, %v2812_v25  ;;  %v1333_v25 = vmul.f32 %v2836_v2, %v2836_v2 }
 0x1d1   : > { %v1260_v0 = vadd.f32 %v1259_v48, %v2840_v11  ;;  %v1392_v5 = vadd.f32 %v1391_v63, %v1329_v52  ;;  %v1334_v11 = vmul.f32 %v2864_v58, %v2864_v58 }
 0x1d3   : > { %v1393_v7 = vadd.f32 %v1392_v5, %v1330_v33  ;;  %v1261_v41 = vadd.f32 %v1260_v0, %v2847_v19 }
 0x1d5   : > { %v1262_v9 = vadd.f32 %v1261_v41, %v2829_v51  ;;  %v1394_v10 = vadd.f32 %v1393_v7, %v1331_v8  ;;  %v1336_v51 = vmul.f32 %v2853_v29, %v2853_v29 }
 0x1d7   : > { %v1395_v13 = vadd.f32 %v1394_v10, %v1332_v12  ;;  %v1263_v15 = vadd.f32 %v1262_v9, %v2836_v2  ;;  %v1337_v2 = vmul.f32 %v2860_v46, %v2860_v46 }
 0x1d9   : > { %v1264_v16 = vadd.f32 %v1263_v15, %v2864_v58  ;;  %v1396_v18 = vadd.f32 %v1395_v13, %v1333_v25  ;;  %v1338_v58 = vmul.f32 %v2888_v42, %v2888_v42 }
 0x1db   : > { %v1397_v20 = vadd.f32 %v1396_v18, %v1334_v11  ;;  %v1265_v19 = vadd.f32 %v1264_v16, %v2871_v1 }
 0x1dd   : > { %v1266_v56 = vadd.f32 %v1265_v19, %v2853_v29  ;;  %v1398_v23 = vadd.f32 %v1397_v20, %v1335_v22  ;;  %v1340_v29 = vmul.f32 %v2877_v14, %v2877_v14 }
 0x1df   : > { %v1399_v44 = vadd.f32 %v1398_v23, %v1336_v51  ;;  %v1267_v26 = vadd.f32 %v1266_v56, %v2860_v46  ;;  %v1341_v46 = vmul.f32 %v2884_v31, %v2884_v31 }
 0x1e1   : > { %v1268_v27 = vadd.f32 %v1267_v26, %v2888_v42  ;;  %v1400_v53 = vadd.f32 %v1399_v44, %v1337_v2  ;;  %v1342_v42 = vmul.f32 %v2912_v34, %v2912_v34 }
 0x1e3   : > { %v1401_v28 = vadd.f32 %v1400_v53, %v1338_v58  ;;  %v1269_v1 = vadd.f32 %v1268_v27, %v2895_v54 }
 0x1e5   : > { %v1270_v24 = vadd.f32 %v1269_v1, %v2877_v14  ;;  %v1402_v35 = vadd.f32 %v1401_v28, %v1339_v32  ;;  %v1343_v14 = vmul.f32 %v2921_v45, %v2921_v45 }
 0x1e7   : > { %v1403_v36 = vadd.f32 %v1402_v35, %v1340_v29  ;;  %v1271_v37 = vadd.f32 %v1270_v24, %v2884_v31  ;;  %v1345_v31 = vmul.f32 %v2908_v21, %v2908_v21 }
 0x1e9   : > { %v1272_v30 = vadd.f32 %v1271_v37, %v2912_v34  ;;  %v1404_v39 = vadd.f32 %v1403_v36, %v1341_v46 }
 0x1eb   : > { %v1405_v54 = vadd.f32 %v1404_v39, %v1342_v42  ;;  %v1273_v6 = vadd.f32 %v1272_v30, %v2921_v45 }
 0x1ed   : > { %v1274_v47 = vadd.f32 %v1273_v6, %v2901_v4  ;;  %v1406_v17 = vadd.f32 %v1405_v54, %v1343_v14 }
 0x1ef   : > { %v1275_v34 = vadd.f32 %v1274_v47, %v2908_v21  ;;  %v1407_v49 = vadd.f32 %v1406_v17, %v1344_v43 }
 0x1f1   : > { %v1276_v50 = vrot.slane %v1275_v34, 4  ;;  %v1408_v61 = vadd.f32 %v1407_v49, %v1345_v31 }
 0x1f3   : > { %v1277_v55 = vadd.f32 %v1276_v50, %v1275_v34  ;;  %v1409_v57 = vrot.slane %v1408_v61, 4 }
 0x1f5   : > { %v1278_v40 = vrot.slane %v1277_v55, 2  ;;  %v1410_v3 = vadd.f32 %v1409_v57, %v1408_v61 }
 0x1f7   : > { %v1279_v45 = vadd.f32 %v1278_v40, %v1277_v55  ;;  %v1411_v59 = vrot.slane %v1410_v3, 2 }
 0x1f9   : > { %v1280_v38 = vrot.slane %v1279_v45, 1  ;;  %v1412_v4 = vadd.f32 %v1411_v59, %v1410_v3 }
 0x1fb   : > { %v1413_v60 = vrot.slane %v1412_v4, 1  ;;  %v1281_v21 = vadd.f32 %v1280_v38, %v1279_v45 }
 0x1fd   : > { %v1414_v62 = vadd.f32 %v1413_v60, %v1412_v4 }
 0x1ff   : > { %v1416_v52 = vsel %vm1415_vm0, %v1281_v21, %v1414_v62 }
 0x200   : > { %1417 = vst [vmem:[%s273_s28] sm:$0x3] %v1416_v52 }
 0x201   : > { %2371 = shalt.err (!%p2368_p13)
}
 0x202   : > { %s2372_s9 = scalar_lea.hbm %s3059_s11, 32  ;;  %s2376_s21 = scalar_lea.hbm %s3112_s4, 64 }
 0x203   : > { %p2373_p6 = scmp.ne.s32.totalorder %s3059_s11, %s2372_s9  ;;  %p2377_p8 = scmp.lt.u32.totalorder %s3059_s11, %s3112_s4 }
 0x204   : > { %p2378_p1 = scmp.lt.u32.totalorder %s2376_s21, %s2372_s9  ;;  %p2380_p3 = scmp.lt.u32.totalorder %s2372_s9, %s3059_s11 }
 0x205   : > { %p2374_p7 = pnand %p2373_p6, %p3127_p12 }
 0x206   : > { %p2379_p10 = por %p2378_p1, %p2377_p8 }
 0x207   : > { %p2375_p2 = pneg %p2374_p7 }
 0x208   : > { %p2381_p5 = por %p2380_p3, %p2379_p10 }
 0x20a   : > { %p2382_p9 = pnand %p2381_p5, %p2375_p2 }
 0x20c   : > { %2385 = shalt.err (!%p2382_p9)
}
 0x20d   : > { %2123 = dma.vmem_to_hbm [thread:$0]  (%p3127_p12), %s3061_s8, 32, %s3059_s11, %s1424_s29  }
 0x20e PF: > { %s1468_s14 = sand.u32 1, %s2428_s15   ;;  %p3128_p11 = scmp.ne.s32.totalorder %s3120_s26, 0 }
 0x20f   : > { %p3129_p0 = scmp.ge.s32.totalorder %s2448_s20, 2  ;;  %s1469_s28 = scalar_lea.sflag [#allocation4], %s1468_s14 }
 0x211   : > { %p2138_p4 = pnand %p3129_p0, %p3128_p11 }
 0x213   : > { %2419 = dma.done.wait (!%p2138_p4), %s1469_s28, 4096  }
 0x214   : > { %2421 = vsyncadd (!%p2138_p4), %s1469_s28, 4294963200  ;;  %s1478_s10 = scalar_lea.sflag [#allocation10], %s1468_s14 }
 0x215   : > { %2423 = dma.done.wait (!%p2138_p4), %s1478_s10, 32  }
 0x216   : > { %2425 = vsyncadd (!%p2138_p4), %s1478_s10, 4294967264  ;;  %s25_s20 = sadd.s32 1, %s2448_s20   ;;  %s3130_s15 = smov %s2432_s16 }
 0x217   : > { %p22_p13 = scmp.ge.s32.totalorder %s25_s20, 4   ;;  %s3131_s16 = smov %s2436_s17 }
 0x218   : > { %s3132_s17 = smov %s2630_s12  ;;  %s3133_s18 = smov %s2444_s19 }
 0x219   : > { %s3134_s19 = smov %s3136_s7  ;;  %24 = sbr.rel (!%p22_p13) target bundleno = 9 (0x9), region = 102 }
 0x220   :  { %1483 = vsyncpa [#allocation3], 1 }
 0x221   :  { %1485 = vsyncpa [#allocation3 + $0x1], 1 }
 0x222   :  { %1486 = vsyncpa [#allocation6], 1 }
 0x223   :  { %1487 = vsyncpa [#allocation4], 1 }
 0x224   :  { %1489 = vsyncpa [#allocation4 + $0x1], 1 }
 0x225   :  { %1490 = vsyncpa [#allocation10], 1 }
 0x226   :  { %1492 = vsyncpa [#allocation10 + $0x1], 1 }

</bundles_post_ra>
